<compile_context>
chip_gen: v7x
topology: tpu7x:2x2x1
jax: 0.10.0
libtpu: 0.0.40
codegen_flags: <defaults>
</compile_context>

<pallas_src>
import functools

import numpy as np

import jax
import jax.numpy as jnp
from jax.experimental import pallas as pl
from jax.experimental.pallas import tpu as pltpu


# ----------------------------------------------------------------------------
# small helpers
# ----------------------------------------------------------------------------
def _cdiv(a, b):
    return -(-a // b)


def _round_up(x, m):
    return _cdiv(x, m) * m


def _geometry(k, s, p):
    """Shared geometry for the stride-s conv / conv-transpose decompositions."""
    if k % s != 0:
        # TODO(synk): general k % s != 0 (fall back to dilated formulation).
        raise NotImplementedError("requires kernel_size % stride == 0")
    t = k // s                                   # taps per phase
    a = [(u + p) // s for u in range(s)]         # per-output-phase row offset
    a_min, a_max = min(a), max(a)
    wlen = a_max - a_min + t                     # decoder window length
    front = max(0, (t - 1) - a_min)              # zero rows in front of zq
    woff = a_min - (t - 1) + front               # window start offset (>= 0)
    return t, wlen, front, woff, a_min


def _compiler_params():
    """Per-generation scoped-VMEM limit (96 MiB v5e/v6e, 48 MiB v7x)."""
    try:
        cap = int(pltpu.get_tpu_info().vmem_capacity_bytes)
        limit = max(32 * 1024 * 1024, min(96 * 1024 * 1024, (cap * 3) // 4))
    except Exception:
        limit = 32 * 1024 * 1024
    return pltpu.CompilerParams(
        dimension_semantics=("parallel",),        # batch axis -> 2 TCs on v7x
        vmem_limit_bytes=limit,
    )


# ----------------------------------------------------------------------------
# Pallas kernels
# ----------------------------------------------------------------------------
def _enc_vq_kernel(x_ref, w_ref, b_ref, cbt_ref, cb_ref, cbsq_ref, zq_ref,
                   *, hq, wq, t):
    """Fused encoder conv (space-to-depth, stride-1) + bias + ReLU + VQ.

    x_ref   : [1, Hs, Ws, Cs]   f32   space-to-depth padded input (resident)
    w_ref   : [t*t, Cs, Dp]     bf16  encoder weight per tap
    b_ref   : [1, Dp]           f32
    cbt_ref : [Dp, n_codes]     f32   transposed codebook (for distances)
    cb_ref  : [n_codes, Dp]     f32   codebook (for the one-hot lookup)
    cbsq_ref: [1, n_codes]      f32   precomputed ||c||^2
    zq_ref  : [1, hq, wq, Dp]   f32   quantized map (padded lanes are zero)
    """
    cs = x_ref.shape[-1]
    dp = w_ref.shape[-1]
    m = hq * wq

    # ---- encoder conv: in-kernel window slicing (no HBM im2col) ----
    acc = jnp.zeros((m, dp), jnp.float32)
    for mh in range(t):
        for mw in range(t):
            win = x_ref[0, mh:mh + hq, mw:mw + wq, :]          # [hq, wq, Cs]
            win = win.reshape(m, cs).astype(jnp.bfloat16)
            acc = acc + jnp.dot(win, w_ref[mh * t + mw],
                                preferred_element_type=jnp.float32)
    enc = jnp.maximum(acc + b_ref[...], 0.0)                   # [m, Dp] f32

    # ---- VQ: nearest codebook entry (f32 for argmin stability) ----
    # d(m,k) = ||c_k||^2 - 2 z_m.c_k   (per-row ||z||^2 dropped: argmin-invariant)
    dots = jnp.dot(enc, cbt_ref[...], preferred_element_type=jnp.float32)
    dist = cbsq_ref[...] - 2.0 * dots                          # [m, n_codes]
    n_codes = dist.shape[-1]

    # argmin with first-index tie-break (matches torch.argmin).
    min_d = jnp.min(dist, axis=-1, keepdims=True)
    iota = jax.lax.broadcasted_iota(jnp.int32, dist.shape, 1)
    cand = jnp.where(dist == min_d, iota, jnp.int32(n_codes))
    idx = jnp.min(cand, axis=-1, keepdims=True)                # [m, 1]

    onehot = (iota == idx).astype(jnp.float32)                 # [m, n_codes]
    zq = jnp.dot(onehot, cb_ref[...], preferred_element_type=jnp.float32)
    zq_ref[...] = zq.reshape(zq_ref.shape).astype(zq_ref.dtype)


def _decoder_kernel(zp_ref, w_ref, b_ref, o_ref, *, nh, nw, wlen, woff):
    """ConvTranspose2d as a stride-1 (wlen x wlen) conv over the padded latent.

    zp_ref : [1, Hzp, Wzp, Dp]           f32  padded quantized map (resident)
    w_ref  : [wlen*wlen, Dp, n_dec]      bf16 sub-pixel weights
    b_ref  : [1, n_dec]                  f32
    o_ref  : [1, nh, nw, n_dec]          f32  (n_dec cols ordered (uh, uw, c))
    """
    dp = zp_ref.shape[-1]
    n_dec = o_ref.shape[-1]
    m = nh * nw

    acc = jnp.zeros((m, n_dec), jnp.float32)
    for wh in range(wlen):
        for ww in range(wlen):
            win = zp_ref[0, woff + wh:woff + wh + nh, woff + ww:woff + ww + nw, :]
            win = win.reshape(m, dp).astype(jnp.bfloat16)
            acc = acc + jnp.dot(win, w_ref[wh * wlen + ww],
                                preferred_element_type=jnp.float32)
    acc = acc + b_ref[...]
    o_ref[...] = acc.reshape(o_ref.shape).astype(o_ref.dtype)


# ----------------------------------------------------------------------------
# Pallas wrappers
# ----------------------------------------------------------------------------
def pallas_enc_vq(xs, w_enc, b_enc, cb_t, cb, cb_sq, *, hq, wq, t):
    bsz, hs, ws, cs = xs.shape
    dp = w_enc.shape[-1]
    n_codes = cb.shape[0]
    m = hq * wq

    flops = 2 * bsz * m * (t * t * cs) * dp + 4 * bsz * m * dp * n_codes
    bytes_acc = (xs.size * 4 + w_enc.size * 2 + b_enc.size * 4 + cb_t.size * 4
                 + cb.size * 4 + cb_sq.size * 4 + bsz * m * dp * 4)

    return pl.pallas_call(
        functools.partial(_enc_vq_kernel, hq=hq, wq=wq, t=t),
        out_shape=jax.ShapeDtypeStruct((bsz, hq, wq, dp), jnp.float32),
        grid=(bsz,),
        in_specs=[
            pl.BlockSpec((1, hs, ws, cs), lambda b: (b, 0, 0, 0)),   # per-batch input
            pl.BlockSpec((t * t, cs, dp), lambda b: (0, 0, 0)),      # resident weight
            pl.BlockSpec((1, dp), lambda b: (0, 0)),                 # resident bias
            pl.BlockSpec((dp, n_codes), lambda b: (0, 0)),           # codebook^T
            pl.BlockSpec((n_codes, dp), lambda b: (0, 0)),           # codebook
            pl.BlockSpec((1, n_codes), lambda b: (0, 0)),            # ||c||^2
        ],
        out_specs=pl.BlockSpec((1, hq, wq, dp), lambda b: (b, 0, 0, 0)),
        compiler_params=_compiler_params(),
        cost_estimate=pl.CostEstimate(flops=int(flops), transcendentals=0,
                                      bytes_accessed=int(bytes_acc)),
    )(xs, w_enc, b_enc, cb_t, cb, cb_sq)


def pallas_decoder(zp, w_dec, b_dec, *, nh, nw, wlen, woff):
    bsz, hzp, wzp, dp = zp.shape
    n_dec = w_dec.shape[-1]
    m = nh * nw

    flops = 2 * bsz * m * (wlen * wlen * dp) * n_dec
    bytes_acc = zp.size * 4 + w_dec.size * 2 + b_dec.size * 4 + bsz * m * n_dec * 4

    return pl.pallas_call(
        functools.partial(_decoder_kernel, nh=nh, nw=nw, wlen=wlen, woff=woff),
        out_shape=jax.ShapeDtypeStruct((bsz, nh, nw, n_dec), jnp.float32),
        grid=(bsz,),
        in_specs=[
            pl.BlockSpec((1, hzp, wzp, dp), lambda b: (b, 0, 0, 0)),   # per-batch latent
            pl.BlockSpec((wlen * wlen, dp, n_dec), lambda b: (0, 0, 0)),
            pl.BlockSpec((1, n_dec), lambda b: (0, 0)),
        ],
        out_specs=pl.BlockSpec((1, nh, nw, n_dec), lambda b: (b, 0, 0, 0)),
        compiler_params=_compiler_params(),
        cost_estimate=pl.CostEstimate(flops=int(flops), transcendentals=0,
                                      bytes_accessed=int(bytes_acc)),
    )(zp, w_dec, b_dec)


# ----------------------------------------------------------------------------
# Parameter init (PyTorch layouts) + one-time kernel-layout preparation
# ----------------------------------------------------------------------------
def init_params(key, c_in, channel, k, n_codes=512):
    k0, k1, k2, k3, k4 = jax.random.split(key, 5)
    scale_e = 1.0 / float(np.sqrt(c_in * k * k))
    scale_d = 1.0 / float(np.sqrt(channel * k * k))
    return {
        "enc_w": jax.random.uniform(k0, (channel, c_in, k, k), jnp.float32,
                                    -scale_e, scale_e),
        "enc_b": jax.random.uniform(k1, (channel,), jnp.float32, -scale_e, scale_e),
        # ConvTranspose2d weight layout: [in_channels=channel, out_channels=c_in, k, k]
        "dec_w": jax.random.uniform(k2, (channel, c_in, k, k), jnp.float32,
                                    -scale_d, scale_d),
        "dec_b": jax.random.uniform(k3, (c_in,), jnp.float32, -scale_d, scale_d),
        "codebook": jax.random.normal(k4, (n_codes, channel), jnp.float32),
    }


def prepare_params(params, c_in, channel, k, s, p):
    """One-time reshuffle of params into lane-dense kernel layouts."""
    t, wlen, front, woff, a_min = _geometry(k, s, p)
    dp = _round_up(channel, 128)
    cs = s * s * c_in
    n_dec = _round_up(s * s * c_in, 128)

    enc_w = np.asarray(params["enc_w"], np.float32)    # [channel, c_in, k, k]
    enc_b = np.asarray(params["enc_b"], np.float32)
    dec_w = np.asarray(params["dec_w"], np.float32)    # [channel, c_in, k, k]
    dec_b = np.asarray(params["dec_b"], np.float32)
    cb = np.asarray(params["codebook"], np.float32)    # [n_codes, channel]
    n_codes = cb.shape[0]

    # Encoder: stride-s conv == stride-1 (t x t) conv over the space-to-depth
    # input; feature order inside Cs is (rh, rw, ci), output cols padded to Dp.
    w_enc = np.zeros((t, t, s, s, c_in, dp), np.float32)
    for mh in range(t):
        for mw in range(t):
            for rh in range(s):
                for rw in range(s):
                    w_enc[mh, mw, rh, rw, :, :channel] = \
                        enc_w[:, :, mh * s + rh, mw * s + rw].T
    w_enc = w_enc.reshape(t * t, cs, dp)
    b_enc = np.zeros((1, dp), np.float32)
    b_enc[0, :channel] = enc_b

    # Codebook: padded feature axis, pre-transposed copy, precomputed norms.
    cb_p = np.zeros((n_codes, dp), np.float32)
    cb_p[:, :channel] = cb
    cb_t = np.ascontiguousarray(cb_p.T)
    cb_sq = np.sum(cb * cb, axis=-1)[None, :].astype(np.float32)

    # Decoder: ConvTranspose2d as a stride-1 (wlen x wlen) conv over the
    # zero-padded latent; output columns ordered (uh, uw, c_out), padded to n_dec.
    wd = np.zeros((wlen, wlen, dp, s, s, c_in), np.float32)
    for uh in range(s):
        ah, rph = (uh + p) // s, (uh + p) % s
        for mh in range(t):
            wh = ah - a_min + (t - 1) - mh
            kh = mh * s + rph
            for uw in range(s):
                aw, rpw = (uw + p) // s, (uw + p) % s
                for mw in range(t):
                    ww = aw - a_min + (t - 1) - mw
                    kw = mw * s + rpw
                    wd[wh, ww, :channel, uh, uw, :] = dec_w[:, :, kh, kw]
    w_dec = np.zeros((wlen * wlen, dp, n_dec), np.float32)
    w_dec[:, :, :s * s * c_in] = wd.reshape(wlen * wlen, dp, s * s * c_in)
    b_dec = np.zeros((1, n_dec), np.float32)
    b_dec[0, :s * s * c_in] = np.tile(dec_b, s * s)

    return {
        "w_enc": jnp.asarray(w_enc, jnp.bfloat16),     # bf16 MXU operands
        "b_enc": jnp.asarray(b_enc),
        "cb_t": jnp.asarray(cb_t),                     # f32: argmin stability
        "codebook": jnp.asarray(cb_p),
        "cb_sq": jnp.asarray(cb_sq),
        "w_dec": jnp.asarray(w_dec, jnp.bfloat16),
        "b_dec": jnp.asarray(b_dec),
    }


# ----------------------------------------------------------------------------
# AutoEncoder forward
# ----------------------------------------------------------------------------
def autoencoder_forward(x, prep, *, c_in, channel, k, s, p):
    bsz, _, h, w = x.shape
    t, wlen, front, woff, _ = _geometry(k, s, p)

    # ---- Encoder input: pad + space-to-depth (1x traffic; replaces HBM im2col) ----
    x_nhwc = jnp.transpose(x, (0, 2, 3, 1))
    hp, wp = h + 2 * p, w + 2 * p
    hp2, wp2 = _round_up(hp, s), _round_up(wp, s)
    xp = jnp.pad(x_nhwc, ((0, 0), (p, p + hp2 - hp), (p, p + wp2 - wp), (0, 0)))
    hs, ws = hp2 // s, wp2 // s
    xs = xp.reshape(bsz, hs, s, ws, s, c_in).transpose(0, 1, 3, 2, 4, 5)
    xs = xs.reshape(bsz, hs, ws, s * s * c_in)
    hq = (h + 2 * p - k) // s + 1
    wq = (w + 2 * p - k) // s + 1

    # ---- Encoder + Quantizer (single fused Pallas kernel) ----
    zq = pallas_enc_vq(xs, prep["w_enc"], prep["b_enc"], prep["cb_t"],
                       prep["codebook"], prep["cb_sq"], hq=hq, wq=wq, t=t)
    # zq: [B, hq, wq, Dp] — padded channel lanes are zero; consumed as-is below
    # (no channel slice / re-pad between the two kernels).

    # ---- Decoder: ConvTranspose2d via sub-pixel decomposition ----
    ho = (hq - 1) * s - 2 * p + k
    wo = (wq - 1) * s - 2 * p + k
    if ho % s or wo % s:
        # TODO(synk): ragged phase counts (Ho % s != 0) not needed for this config.
        raise NotImplementedError("decoder phase decomposition requires Ho % s == 0")
    nh, nw = ho // s, wo // s
    hzp = max(front + hq, woff + nh - 1 + wlen)
    wzp = max(front + wq, woff + nw - 1 + wlen)
    zp = jnp.pad(zq, ((0, 0), (front, hzp - front - hq),
                      (front, wzp - front - wq), (0, 0)))

    dec = pallas_decoder(zp, prep["w_dec"], prep["b_dec"],
                         nh=nh, nw=nw, wlen=wlen, woff=woff)
    dec = dec[..., :s * s * c_in].reshape(bsz, nh, nw, s, s, c_in)
    out = dec.transpose(0, 1, 3, 2, 4, 5).reshape(bsz, ho, wo, c_in)  # pixel shuffle
    return jnp.transpose(out, (0, 3, 1, 2))                           # NHWC -> NCHW


if __name__ == "__main__":
    # Small shapes consistent with the module: batch=2, channels=4, spatial=16
    B, C_IN, H, W = 2, 4, 16, 16
    CHANNEL, K_SZ, STRIDE, PAD = 8, 4, 2, 1

    key = jax.random.PRNGKey(0)
    k_x, k_p = jax.random.split(key)
    x = jax.random.normal(k_x, (B, C_IN, H, W), jnp.float32)
    params = init_params(k_p, C_IN, CHANNEL, K_SZ)
    prep = prepare_params(params, C_IN, CHANNEL, K_SZ, STRIDE, PAD)

    fwd = jax.jit(functools.partial(
        autoencoder_forward, c_in=C_IN, channel=CHANNEL, k=K_SZ, s=STRIDE, p=PAD))
    decoded = fwd(x, prep)
    jax.block_until_ready(decoded)

    assert decoded.shape == (B, C_IN, H, W), decoded.shape
    assert decoded.dtype == jnp.float32
    assert bool(jnp.all(jnp.isfinite(decoded)))
    print("KERNEL_OK")
</pallas_src>

<mosaic_0001>
module attributes {stable_mosaic.version = 11 : i64} {
  func.func @_enc_vq_kernel(%arg0: i32, %arg1: memref<1x9x9x16xf32, #tpu.memory_space<vmem>>, %arg2: memref<4x16x128xbf16, #tpu.memory_space<vmem>>, %arg3: memref<1x128xf32, #tpu.memory_space<vmem>>, %arg4: memref<128x512xf32, #tpu.memory_space<vmem>>, %arg5: memref<512x128xf32, #tpu.memory_space<vmem>>, %arg6: memref<1x512xf32, #tpu.memory_space<vmem>>, %arg7: memref<1x8x8x128xf32, #tpu.memory_space<vmem>>) attributes {dimension_semantics = [#tpu.dimension_semantics<parallel>], iteration_bounds = array<i64: 2>, scalar_prefetch = 0 : i64, scratch_operands = 0 : i64, tpu.core_type = #tpu.core_type<tc>, window_params = [{transform_indices = @transform_0, window_bounds = array<i64: 1, 9, 9, 16>}, {pipeline_mode = #tpu.pipeline_mode<synchronous>, transform_indices = @transform_1, window_bounds = array<i64: 4, 16, 128>}, {pipeline_mode = #tpu.pipeline_mode<synchronous>, transform_indices = @transform_2, window_bounds = array<i64: 1, 128>}, {pipeline_mode = #tpu.pipeline_mode<synchronous>, transform_indices = @transform_3, window_bounds = array<i64: 128, 512>}, {pipeline_mode = #tpu.pipeline_mode<synchronous>, transform_indices = @transform_4, window_bounds = array<i64: 512, 128>}, {pipeline_mode = #tpu.pipeline_mode<synchronous>, transform_indices = @transform_5, window_bounds = array<i64: 1, 512>}, {transform_indices = @transform_6, window_bounds = array<i64: 1, 8, 8, 128>}]} {
    %cst = arith.constant 0.000000e+00 : f32
    %0 = vector.broadcast %cst : f32 to vector<64x128xf32>
    %c0 = arith.constant 0 : index
    %c0_0 = arith.constant 0 : index
    %c0_1 = arith.constant 0 : index
    %c0_2 = arith.constant 0 : index
    %1 = vector.load %arg1[%c0, %c0_0, %c0_1, %c0_2] : memref<1x9x9x16xf32, #tpu.memory_space<vmem>>, vector<1x8x8x16xf32>
    %2 = vector.shape_cast %1 : vector<1x8x8x16xf32> to vector<8x8x16xf32>
    %3 = vector.shape_cast %2 : vector<8x8x16xf32> to vector<64x16xf32>
    %4 = arith.truncf %3 : vector<64x16xf32> to vector<64x16xbf16>
    %c0_3 = arith.constant 0 : index
    %c0_4 = arith.constant 0 : index
    %c0_5 = arith.constant 0 : index
    %5 = vector.load %arg2[%c0_3, %c0_4, %c0_5] : memref<4x16x128xbf16, #tpu.memory_space<vmem>>, vector<1x16x128xbf16>
    %6 = vector.shape_cast %5 : vector<1x16x128xbf16> to vector<16x128xbf16>
    %cst_6 = arith.constant dense<0.000000e+00> : vector<64x128xf32>
    %7 = tpu.matmul %4, %6, %cst_6 {dimension_numbers = #tpu.dot_dimension_numbers<[1], [0], [0], [1], [0, 0, 1, 1], [], []>} : vector<64x16xbf16>, vector<16x128xbf16>, vector<64x128xf32> -> vector<64x128xf32>
    %8 = arith.addf %0, %7 : vector<64x128xf32>
    %c0_7 = arith.constant 0 : index
    %c0_8 = arith.constant 0 : index
    %c1 = arith.constant 1 : index
    %c0_9 = arith.constant 0 : index
    %9 = vector.load %arg1[%c0_7, %c0_8, %c1, %c0_9] : memref<1x9x9x16xf32, #tpu.memory_space<vmem>>, vector<1x8x8x16xf32>
    %10 = vector.shape_cast %9 : vector<1x8x8x16xf32> to vector<8x8x16xf32>
    %11 = vector.shape_cast %10 : vector<8x8x16xf32> to vector<64x16xf32>
    %12 = arith.truncf %11 : vector<64x16xf32> to vector<64x16xbf16>
    %c1_10 = arith.constant 1 : index
    %c0_11 = arith.constant 0 : index
    %c0_12 = arith.constant 0 : index
    %13 = vector.load %arg2[%c1_10, %c0_11, %c0_12] : memref<4x16x128xbf16, #tpu.memory_space<vmem>>, vector<1x16x128xbf16>
    %14 = vector.shape_cast %13 : vector<1x16x128xbf16> to vector<16x128xbf16>
    %cst_13 = arith.constant dense<0.000000e+00> : vector<64x128xf32>
    %15 = tpu.matmul %12, %14, %cst_13 {dimension_numbers = #tpu.dot_dimension_numbers<[1], [0], [0], [1], [0, 0, 1, 1], [], []>} : vector<64x16xbf16>, vector<16x128xbf16>, vector<64x128xf32> -> vector<64x128xf32>
    %16 = arith.addf %8, %15 : vector<64x128xf32>
    %c0_14 = arith.constant 0 : index
    %c1_15 = arith.constant 1 : index
    %c0_16 = arith.constant 0 : index
    %c0_17 = arith.constant 0 : index
    %17 = vector.load %arg1[%c0_14, %c1_15, %c0_16, %c0_17] : memref<1x9x9x16xf32, #tpu.memory_space<vmem>>, vector<1x8x8x16xf32>
    %18 = vector.shape_cast %17 : vector<1x8x8x16xf32> to vector<8x8x16xf32>
    %19 = vector.shape_cast %18 : vector<8x8x16xf32> to vector<64x16xf32>
    %20 = arith.truncf %19 : vector<64x16xf32> to vector<64x16xbf16>
    %c2 = arith.constant 2 : index
    %c0_18 = arith.constant 0 : index
    %c0_19 = arith.constant 0 : index
    %21 = vector.load %arg2[%c2, %c0_18, %c0_19] : memref<4x16x128xbf16, #tpu.memory_space<vmem>>, vector<1x16x128xbf16>
    %22 = vector.shape_cast %21 : vector<1x16x128xbf16> to vector<16x128xbf16>
    %cst_20 = arith.constant dense<0.000000e+00> : vector<64x128xf32>
    %23 = tpu.matmul %20, %22, %cst_20 {dimension_numbers = #tpu.dot_dimension_numbers<[1], [0], [0], [1], [0, 0, 1, 1], [], []>} : vector<64x16xbf16>, vector<16x128xbf16>, vector<64x128xf32> -> vector<64x128xf32>
    %24 = arith.addf %16, %23 : vector<64x128xf32>
    %c0_21 = arith.constant 0 : index
    %c1_22 = arith.constant 1 : index
    %c1_23 = arith.constant 1 : index
    %c0_24 = arith.constant 0 : index
    %25 = vector.load %arg1[%c0_21, %c1_22, %c1_23, %c0_24] : memref<1x9x9x16xf32, #tpu.memory_space<vmem>>, vector<1x8x8x16xf32>
    %26 = vector.shape_cast %25 : vector<1x8x8x16xf32> to vector<8x8x16xf32>
    %27 = vector.shape_cast %26 : vector<8x8x16xf32> to vector<64x16xf32>
    %28 = arith.truncf %27 : vector<64x16xf32> to vector<64x16xbf16>
    %c3 = arith.constant 3 : index
    %c0_25 = arith.constant 0 : index
    %c0_26 = arith.constant 0 : index
    %29 = vector.load %arg2[%c3, %c0_25, %c0_26] : memref<4x16x128xbf16, #tpu.memory_space<vmem>>, vector<1x16x128xbf16>
    %30 = vector.shape_cast %29 : vector<1x16x128xbf16> to vector<16x128xbf16>
    %cst_27 = arith.constant dense<0.000000e+00> : vector<64x128xf32>
    %31 = tpu.matmul %28, %30, %cst_27 {dimension_numbers = #tpu.dot_dimension_numbers<[1], [0], [0], [1], [0, 0, 1, 1], [], []>} : vector<64x16xbf16>, vector<16x128xbf16>, vector<64x128xf32> -> vector<64x128xf32>
    %32 = arith.addf %24, %31 : vector<64x128xf32>
    %c0_28 = arith.constant 0 : index
    %c0_29 = arith.constant 0 : index
    %33 = vector.load %arg3[%c0_28, %c0_29] : memref<1x128xf32, #tpu.memory_space<vmem>>, vector<1x128xf32>
    %34 = vector.broadcast %33 : vector<1x128xf32> to vector<64x128xf32>
    %35 = arith.addf %32, %34 : vector<64x128xf32>
    %cst_30 = arith.constant 0.000000e+00 : f32
    %36 = vector.broadcast %cst_30 : f32 to vector<64x128xf32>
    %37 = arith.maximumf %35, %36 : vector<64x128xf32>
    %c0_31 = arith.constant 0 : index
    %c0_32 = arith.constant 0 : index
    %38 = vector.load %arg4[%c0_31, %c0_32] : memref<128x512xf32, #tpu.memory_space<vmem>>, vector<128x512xf32>
    %cst_33 = arith.constant dense<0.000000e+00> : vector<64x512xf32>
    %39 = tpu.matmul %37, %38, %cst_33 {dimension_numbers = #tpu.dot_dimension_numbers<[1], [0], [0], [1], [0, 0, 1, 1], [], []>} : vector<64x128xf32>, vector<128x512xf32>, vector<64x512xf32> -> vector<64x512xf32>
    %c0_34 = arith.constant 0 : index
    %c0_35 = arith.constant 0 : index
    %40 = vector.load %arg6[%c0_34, %c0_35] : memref<1x512xf32, #tpu.memory_space<vmem>>, vector<1x512xf32>
    %cst_36 = arith.constant 2.000000e+00 : f32
    %41 = vector.broadcast %cst_36 : f32 to vector<64x512xf32>
    %42 = arith.mulf %41, %39 : vector<64x512xf32>
    %43 = vector.broadcast %40 : vector<1x512xf32> to vector<64x512xf32>
    %44 = arith.subf %43, %42 : vector<64x512xf32>
    %cst_37 = arith.constant dense<0x7F800000> : vector<64xf32>
    %45 = vector.multi_reduction <minimumf>, %44, %cst_37 [1] : vector<64x512xf32> to vector<64xf32>
    %46 = vector.shape_cast %45 : vector<64xf32> to vector<64x1xf32>
    %47 = tpu.iota {dimensions = array<i32: 1>} : vector<64x512xi32>
    %48 = vector.broadcast %46 : vector<64x1xf32> to vector<64x512xf32>
    %49 = arith.cmpf oeq, %44, %48 : vector<64x512xf32>
    %c512_i32 = arith.constant 512 : i32
    %50 = vector.broadcast %c512_i32 : i32 to vector<64x512xi32>
    %51 = arith.select %49, %47, %50 : vector<64x512xi1>, vector<64x512xi32>
    %cst_38 = arith.constant dense<2147483647> : vector<64xi32>
    %52 = vector.multi_reduction <minsi>, %51, %cst_38 [1] : vector<64x512xi32> to vector<64xi32>
    %53 = vector.shape_cast %52 : vector<64xi32> to vector<64x1xi32>
    %54 = vector.broadcast %53 : vector<64x1xi32> to vector<64x512xi32>
    %55 = arith.cmpi eq, %47, %54 : vector<64x512xi32>
    %56 = arith.extui %55 : vector<64x512xi1> to vector<64x512xi32>
    %57 = arith.sitofp %56 : vector<64x512xi32> to vector<64x512xf32>
    %c0_39 = arith.constant 0 : index
    %c0_40 = arith.constant 0 : index
    %58 = vector.load %arg5[%c0_39, %c0_40] : memref<512x128xf32, #tpu.memory_space<vmem>>, vector<512x128xf32>
    %cst_41 = arith.constant dense<0.000000e+00> : vector<64x128xf32>
    %59 = tpu.matmul %57, %58, %cst_41 {dimension_numbers = #tpu.dot_dimension_numbers<[1], [0], [0], [1], [0, 0, 1, 1], [], []>} : vector<64x512xf32>, vector<512x128xf32>, vector<64x128xf32> -> vector<64x128xf32>
    %60 = vector.shape_cast %59 : vector<64x128xf32> to vector<1x8x8x128xf32>
    %c0_42 = arith.constant 0 : index
    %c0_43 = arith.constant 0 : index
    %c0_44 = arith.constant 0 : index
    %c0_45 = arith.constant 0 : index
    %61 = vector.load %arg7[%c0_42, %c0_43, %c0_44, %c0_45] : memref<1x8x8x128xf32, #tpu.memory_space<vmem>>, vector<1x8x8x128xf32>
    tpu.vector_store %arg7[%c0_42, %c0_43, %c0_44, %c0_45], %60 {strides = array<i32>} : memref<1x8x8x128xf32, #tpu.memory_space<vmem>>, vector<1x8x8x128xf32>,
    return
  }
  func.func @transform_0(%arg0: i32) -> (i32, i32, i32, i32) {
    %c0_i32 = arith.constant 0 : i32
    %c0_i32_0 = arith.constant 0 : i32
    %c0_i32_1 = arith.constant 0 : i32
    %c0_i32_2 = arith.constant 0 : i32
    return %arg0, %c0_i32, %c0_i32_0, %c0_i32_1 : i32, i32, i32, i32
  }
  func.func @transform_1(%arg0: i32) -> (i32, i32, i32) {
    %c0_i32 = arith.constant 0 : i32
    %c0_i32_0 = arith.constant 0 : i32
    %c0_i32_1 = arith.constant 0 : i32
    %c0_i32_2 = arith.constant 0 : i32
    return %c0_i32, %c0_i32_0, %c0_i32_1 : i32, i32, i32
  }
  func.func @transform_2(%arg0: i32) -> (i32, i32) {
    %c0_i32 = arith.constant 0 : i32
    %c0_i32_0 = arith.constant 0 : i32
    %c0_i32_1 = arith.constant 0 : i32
    return %c0_i32, %c0_i32_0 : i32, i32
  }
  func.func @transform_3(%arg0: i32) -> (i32, i32) {
    %c0_i32 = arith.constant 0 : i32
    %c0_i32_0 = arith.constant 0 : i32
    %c0_i32_1 = arith.constant 0 : i32
    return %c0_i32, %c0_i32_0 : i32, i32
  }
  func.func @transform_4(%arg0: i32) -> (i32, i32) {
    %c0_i32 = arith.constant 0 : i32
    %c0_i32_0 = arith.constant 0 : i32
    %c0_i32_1 = arith.constant 0 : i32
    return %c0_i32, %c0_i32_0 : i32, i32
  }
  func.func @transform_5(%arg0: i32) -> (i32, i32) {
    %c0_i32 = arith.constant 0 : i32
    %c0_i32_0 = arith.constant 0 : i32
    %c0_i32_1 = arith.constant 0 : i32
    return %c0_i32, %c0_i32_0 : i32, i32
  }
  func.func @transform_6(%arg0: i32) -> (i32, i32, i32, i32) {
    %c0_i32 = arith.constant 0 : i32
    %c0_i32_0 = arith.constant 0 : i32
    %c0_i32_1 = arith.constant 0 : i32
    %c0_i32_2 = arith.constant 0 : i32
    return %arg0, %c0_i32, %c0_i32_0, %c0_i32_1 : i32, i32, i32, i32
  }
}

module attributes {stable_mosaic.version = 11 : i64} {
  func.func @_decoder_kernel(%arg0: i32, %arg1: memref<1x10x10x128xf32, #tpu.memory_space<vmem>>, %arg2: memref<9x128x128xbf16, #tpu.memory_space<vmem>>, %arg3: memref<1x128xf32, #tpu.memory_space<vmem>>, %arg4: memref<1x8x8x128xf32, #tpu.memory_space<vmem>>) attributes {dimension_semantics = [#tpu.dimension_semantics<parallel>], iteration_bounds = array<i64: 2>, scalar_prefetch = 0 : i64, scratch_operands = 0 : i64, tpu.core_type = #tpu.core_type<tc>, window_params = [{transform_indices = @transform_0, window_bounds = array<i64: 1, 10, 10, 128>}, {pipeline_mode = #tpu.pipeline_mode<synchronous>, transform_indices = @transform_1, window_bounds = array<i64: 9, 128, 128>}, {pipeline_mode = #tpu.pipeline_mode<synchronous>, transform_indices = @transform_2, window_bounds = array<i64: 1, 128>}, {transform_indices = @transform_3, window_bounds = array<i64: 1, 8, 8, 128>}]} {
    %cst = arith.constant 0.000000e+00 : f32
    %0 = vector.broadcast %cst : f32 to vector<64x128xf32>
    %c0 = arith.constant 0 : index
    %c0_0 = arith.constant 0 : index
    %c0_1 = arith.constant 0 : index
    %c0_2 = arith.constant 0 : index
    %1 = vector.load %arg1[%c0, %c0_0, %c0_1, %c0_2] : memref<1x10x10x128xf32, #tpu.memory_space<vmem>>, vector<1x8x8x128xf32>
    %2 = vector.shape_cast %1 : vector<1x8x8x128xf32> to vector<8x8x128xf32>
    %3 = vector.shape_cast %2 : vector<8x8x128xf32> to vector<64x128xf32>
    %4 = arith.truncf %3 : vector<64x128xf32> to vector<64x128xbf16>
    %c0_3 = arith.constant 0 : index
    %c0_4 = arith.constant 0 : index
    %c0_5 = arith.constant 0 : index
    %5 = vector.load %arg2[%c0_3, %c0_4, %c0_5] : memref<9x128x128xbf16, #tpu.memory_space<vmem>>, vector<1x128x128xbf16>
    %6 = vector.shape_cast %5 : vector<1x128x128xbf16> to vector<128x128xbf16>
    %cst_6 = arith.constant dense<0.000000e+00> : vector<64x128xf32>
    %7 = tpu.matmul %4, %6, %cst_6 {dimension_numbers = #tpu.dot_dimension_numbers<[1], [0], [0], [1], [0, 0, 1, 1], [], []>} : vector<64x128xbf16>, vector<128x128xbf16>, vector<64x128xf32> -> vector<64x128xf32>
    %8 = arith.addf %0, %7 : vector<64x128xf32>
    %c0_7 = arith.constant 0 : index
    %c0_8 = arith.constant 0 : index
    %c1 = arith.constant 1 : index
    %c0_9 = arith.constant 0 : index
    %9 = vector.load %arg1[%c0_7, %c0_8, %c1, %c0_9] : memref<1x10x10x128xf32, #tpu.memory_space<vmem>>, vector<1x8x8x128xf32>
    %10 = vector.shape_cast %9 : vector<1x8x8x128xf32> to vector<8x8x128xf32>
    %11 = vector.shape_cast %10 : vector<8x8x128xf32> to vector<64x128xf32>
    %12 = arith.truncf %11 : vector<64x128xf32> to vector<64x128xbf16>
    %c1_10 = arith.constant 1 : index
    %c0_11 = arith.constant 0 : index
    %c0_12 = arith.constant 0 : index
    %13 = vector.load %arg2[%c1_10, %c0_11, %c0_12] : memref<9x128x128xbf16, #tpu.memory_space<vmem>>, vector<1x128x128xbf16>
    %14 = vector.shape_cast %13 : vector<1x128x128xbf16> to vector<128x128xbf16>
    %cst_13 = arith.constant dense<0.000000e+00> : vector<64x128xf32>
    %15 = tpu.matmul %12, %14, %cst_13 {dimension_numbers = #tpu.dot_dimension_numbers<[1], [0], [0], [1], [0, 0, 1, 1], [], []>} : vector<64x128xbf16>, vector<128x128xbf16>, vector<64x128xf32> -> vector<64x128xf32>
    %16 = arith.addf %8, %15 : vector<64x128xf32>
    %c0_14 = arith.constant 0 : index
    %c0_15 = arith.constant 0 : index
    %c2 = arith.constant 2 : index
    %c0_16 = arith.constant 0 : index
    %17 = vector.load %arg1[%c0_14, %c0_15, %c2, %c0_16] : memref<1x10x10x128xf32, #tpu.memory_space<vmem>>, vector<1x8x8x128xf32>
    %18 = vector.shape_cast %17 : vector<1x8x8x128xf32> to vector<8x8x128xf32>
    %19 = vector.shape_cast %18 : vector<8x8x128xf32> to vector<64x128xf32>
    %20 = arith.truncf %19 : vector<64x128xf32> to vector<64x128xbf16>
    %c2_17 = arith.constant 2 : index
    %c0_18 = arith.constant 0 : index
    %c0_19 = arith.constant 0 : index
    %21 = vector.load %arg2[%c2_17, %c0_18, %c0_19] : memref<9x128x128xbf16, #tpu.memory_space<vmem>>, vector<1x128x128xbf16>
    %22 = vector.shape_cast %21 : vector<1x128x128xbf16> to vector<128x128xbf16>
    %cst_20 = arith.constant dense<0.000000e+00> : vector<64x128xf32>
    %23 = tpu.matmul %20, %22, %cst_20 {dimension_numbers = #tpu.dot_dimension_numbers<[1], [0], [0], [1], [0, 0, 1, 1], [], []>} : vector<64x128xbf16>, vector<128x128xbf16>, vector<64x128xf32> -> vector<64x128xf32>
    %24 = arith.addf %16, %23 : vector<64x128xf32>
    %c0_21 = arith.constant 0 : index
    %c1_22 = arith.constant 1 : index
    %c0_23 = arith.constant 0 : index
    %c0_24 = arith.constant 0 : index
    %25 = vector.load %arg1[%c0_21, %c1_22, %c0_23, %c0_24] : memref<1x10x10x128xf32, #tpu.memory_space<vmem>>, vector<1x8x8x128xf32>
    %26 = vector.shape_cast %25 : vector<1x8x8x128xf32> to vector<8x8x128xf32>
    %27 = vector.shape_cast %26 : vector<8x8x128xf32> to vector<64x128xf32>
    %28 = arith.truncf %27 : vector<64x128xf32> to vector<64x128xbf16>
    %c3 = arith.constant 3 : index
    %c0_25 = arith.constant 0 : index
    %c0_26 = arith.constant 0 : index
    %29 = vector.load %arg2[%c3, %c0_25, %c0_26] : memref<9x128x128xbf16, #tpu.memory_space<vmem>>, vector<1x128x128xbf16>
    %30 = vector.shape_cast %29 : vector<1x128x128xbf16> to vector<128x128xbf16>
    %cst_27 = arith.constant dense<0.000000e+00> : vector<64x128xf32>
    %31 = tpu.matmul %28, %30, %cst_27 {dimension_numbers = #tpu.dot_dimension_numbers<[1], [0], [0], [1], [0, 0, 1, 1], [], []>} : vector<64x128xbf16>, vector<128x128xbf16>, vector<64x128xf32> -> vector<64x128xf32>
    %32 = arith.addf %24, %31 : vector<64x128xf32>
    %c0_28 = arith.constant 0 : index
    %c1_29 = arith.constant 1 : index
    %c1_30 = arith.constant 1 : index
    %c0_31 = arith.constant 0 : index
    %33 = vector.load %arg1[%c0_28, %c1_29, %c1_30, %c0_31] : memref<1x10x10x128xf32, #tpu.memory_space<vmem>>, vector<1x8x8x128xf32>
    %34 = vector.shape_cast %33 : vector<1x8x8x128xf32> to vector<8x8x128xf32>
    %35 = vector.shape_cast %34 : vector<8x8x128xf32> to vector<64x128xf32>
    %36 = arith.truncf %35 : vector<64x128xf32> to vector<64x128xbf16>
    %c4 = arith.constant 4 : index
    %c0_32 = arith.constant 0 : index
    %c0_33 = arith.constant 0 : index
    %37 = vector.load %arg2[%c4, %c0_32, %c0_33] : memref<9x128x128xbf16, #tpu.memory_space<vmem>>, vector<1x128x128xbf16>
    %38 = vector.shape_cast %37 : vector<1x128x128xbf16> to vector<128x128xbf16>
    %cst_34 = arith.constant dense<0.000000e+00> : vector<64x128xf32>
    %39 = tpu.matmul %36, %38, %cst_34 {dimension_numbers = #tpu.dot_dimension_numbers<[1], [0], [0], [1], [0, 0, 1, 1], [], []>} : vector<64x128xbf16>, vector<128x128xbf16>, vector<64x128xf32> -> vector<64x128xf32>
    %40 = arith.addf %32, %39 : vector<64x128xf32>
    %c0_35 = arith.constant 0 : index
    %c1_36 = arith.constant 1 : index
    %c2_37 = arith.constant 2 : index
    %c0_38 = arith.constant 0 : index
    %41 = vector.load %arg1[%c0_35, %c1_36, %c2_37, %c0_38] : memref<1x10x10x128xf32, #tpu.memory_space<vmem>>, vector<1x8x8x128xf32>
    %42 = vector.shape_cast %41 : vector<1x8x8x128xf32> to vector<8x8x128xf32>
    %43 = vector.shape_cast %42 : vector<8x8x128xf32> to vector<64x128xf32>
    %44 = arith.truncf %43 : vector<64x128xf32> to vector<64x128xbf16>
    %c5 = arith.constant 5 : index
    %c0_39 = arith.constant 0 : index
    %c0_40 = arith.constant 0 : index
    %45 = vector.load %arg2[%c5, %c0_39, %c0_40] : memref<9x128x128xbf16, #tpu.memory_space<vmem>>, vector<1x128x128xbf16>
    %46 = vector.shape_cast %45 : vector<1x128x128xbf16> to vector<128x128xbf16>
    %cst_41 = arith.constant dense<0.000000e+00> : vector<64x128xf32>
    %47 = tpu.matmul %44, %46, %cst_41 {dimension_numbers = #tpu.dot_dimension_numbers<[1], [0], [0], [1], [0, 0, 1, 1], [], []>} : vector<64x128xbf16>, vector<128x128xbf16>, vector<64x128xf32> -> vector<64x128xf32>
    %48 = arith.addf %40, %47 : vector<64x128xf32>
    %c0_42 = arith.constant 0 : index
    %c2_43 = arith.constant 2 : index
    %c0_44 = arith.constant 0 : index
    %c0_45 = arith.constant 0 : index
    %49 = vector.load %arg1[%c0_42, %c2_43, %c0_44, %c0_45] : memref<1x10x10x128xf32, #tpu.memory_space<vmem>>, vector<1x8x8x128xf32>
    %50 = vector.shape_cast %49 : vector<1x8x8x128xf32> to vector<8x8x128xf32>
    %51 = vector.shape_cast %50 : vector<8x8x128xf32> to vector<64x128xf32>
    %52 = arith.truncf %51 : vector<64x128xf32> to vector<64x128xbf16>
    %c6 = arith.constant 6 : index
    %c0_46 = arith.constant 0 : index
    %c0_47 = arith.constant 0 : index
    %53 = vector.load %arg2[%c6, %c0_46, %c0_47] : memref<9x128x128xbf16, #tpu.memory_space<vmem>>, vector<1x128x128xbf16>
    %54 = vector.shape_cast %53 : vector<1x128x128xbf16> to vector<128x128xbf16>
    %cst_48 = arith.constant dense<0.000000e+00> : vector<64x128xf32>
    %55 = tpu.matmul %52, %54, %cst_48 {dimension_numbers = #tpu.dot_dimension_numbers<[1], [0], [0], [1], [0, 0, 1, 1], [], []>} : vector<64x128xbf16>, vector<128x128xbf16>, vector<64x128xf32> -> vector<64x128xf32>
    %56 = arith.addf %48, %55 : vector<64x128xf32>
    %c0_49 = arith.constant 0 : index
    %c2_50 = arith.constant 2 : index
    %c1_51 = arith.constant 1 : index
    %c0_52 = arith.constant 0 : index
    %57 = vector.load %arg1[%c0_49, %c2_50, %c1_51, %c0_52] : memref<1x10x10x128xf32, #tpu.memory_space<vmem>>, vector<1x8x8x128xf32>
    %58 = vector.shape_cast %57 : vector<1x8x8x128xf32> to vector<8x8x128xf32>
    %59 = vector.shape_cast %58 : vector<8x8x128xf32> to vector<64x128xf32>
    %60 = arith.truncf %59 : vector<64x128xf32> to vector<64x128xbf16>
    %c7 = arith.constant 7 : index
    %c0_53 = arith.constant 0 : index
    %c0_54 = arith.constant 0 : index
    %61 = vector.load %arg2[%c7, %c0_53, %c0_54] : memref<9x128x128xbf16, #tpu.memory_space<vmem>>, vector<1x128x128xbf16>
    %62 = vector.shape_cast %61 : vector<1x128x128xbf16> to vector<128x128xbf16>
    %cst_55 = arith.constant dense<0.000000e+00> : vector<64x128xf32>
    %63 = tpu.matmul %60, %62, %cst_55 {dimension_numbers = #tpu.dot_dimension_numbers<[1], [0], [0], [1], [0, 0, 1, 1], [], []>} : vector<64x128xbf16>, vector<128x128xbf16>, vector<64x128xf32> -> vector<64x128xf32>
    %64 = arith.addf %56, %63 : vector<64x128xf32>
    %c0_56 = arith.constant 0 : index
    %c2_57 = arith.constant 2 : index
    %c2_58 = arith.constant 2 : index
    %c0_59 = arith.constant 0 : index
    %65 = vector.load %arg1[%c0_56, %c2_57, %c2_58, %c0_59] : memref<1x10x10x128xf32, #tpu.memory_space<vmem>>, vector<1x8x8x128xf32>
    %66 = vector.shape_cast %65 : vector<1x8x8x128xf32> to vector<8x8x128xf32>
    %67 = vector.shape_cast %66 : vector<8x8x128xf32> to vector<64x128xf32>
    %68 = arith.truncf %67 : vector<64x128xf32> to vector<64x128xbf16>
    %c8 = arith.constant 8 : index
    %c0_60 = arith.constant 0 : index
    %c0_61 = arith.constant 0 : index
    %69 = vector.load %arg2[%c8, %c0_60, %c0_61] : memref<9x128x128xbf16, #tpu.memory_space<vmem>>, vector<1x128x128xbf16>
    %70 = vector.shape_cast %69 : vector<1x128x128xbf16> to vector<128x128xbf16>
    %cst_62 = arith.constant dense<0.000000e+00> : vector<64x128xf32>
    %71 = tpu.matmul %68, %70, %cst_62 {dimension_numbers = #tpu.dot_dimension_numbers<[1], [0], [0], [1], [0, 0, 1, 1], [], []>} : vector<64x128xbf16>, vector<128x128xbf16>, vector<64x128xf32> -> vector<64x128xf32>
    %72 = arith.addf %64, %71 : vector<64x128xf32>
    %c0_63 = arith.constant 0 : index
    %c0_64 = arith.constant 0 : index
    %73 = vector.load %arg3[%c0_63, %c0_64] : memref<1x128xf32, #tpu.memory_space<vmem>>, vector<1x128xf32>
    %74 = vector.broadcast %73 : vector<1x128xf32> to vector<64x128xf32>
    %75 = arith.addf %72, %74 : vector<64x128xf32>
    %76 = vector.shape_cast %75 : vector<64x128xf32> to vector<1x8x8x128xf32>
    %c0_65 = arith.constant 0 : index
    %c0_66 = arith.constant 0 : index
    %c0_67 = arith.constant 0 : index
    %c0_68 = arith.constant 0 : index
    %77 = vector.load %arg4[%c0_65, %c0_66, %c0_67, %c0_68] : memref<1x8x8x128xf32, #tpu.memory_space<vmem>>, vector<1x8x8x128xf32>
    tpu.vector_store %arg4[%c0_65, %c0_66, %c0_67, %c0_68], %76 {strides = array<i32>} : memref<1x8x8x128xf32, #tpu.memory_space<vmem>>, vector<1x8x8x128xf32>,
    return
  }
  func.func @transform_0(%arg0: i32) -> (i32, i32, i32, i32) {
    %c0_i32 = arith.constant 0 : i32
    %c0_i32_0 = arith.constant 0 : i32
    %c0_i32_1 = arith.constant 0 : i32
    %c0_i32_2 = arith.constant 0 : i32
    return %arg0, %c0_i32, %c0_i32_0, %c0_i32_1 : i32, i32, i32, i32
  }
  func.func @transform_1(%arg0: i32) -> (i32, i32, i32) {
    %c0_i32 = arith.constant 0 : i32
    %c0_i32_0 = arith.constant 0 : i32
    %c0_i32_1 = arith.constant 0 : i32
    %c0_i32_2 = arith.constant 0 : i32
    return %c0_i32, %c0_i32_0, %c0_i32_1 : i32, i32, i32
  }
  func.func @transform_2(%arg0: i32) -> (i32, i32) {
    %c0_i32 = arith.constant 0 : i32
    %c0_i32_0 = arith.constant 0 : i32
    %c0_i32_1 = arith.constant 0 : i32
    return %c0_i32, %c0_i32_0 : i32, i32
  }
  func.func @transform_3(%arg0: i32) -> (i32, i32, i32, i32) {
    %c0_i32 = arith.constant 0 : i32
    %c0_i32_0 = arith.constant 0 : i32
    %c0_i32_1 = arith.constant 0 : i32
    %c0_i32_2 = arith.constant 0 : i32
    return %arg0, %c0_i32, %c0_i32_0, %c0_i32_1 : i32, i32, i32, i32
  }
}

</mosaic_0001>

<bundles_post_ra>
// kernel: autoencoder_forward.2
= control target key start
LH: loop header
LB: loop body
LE: loop exit
PB: predicated region body
PF: predicated region fallthrough
CT: control target
= control target key end

     0   :  { %s2281_s21 = smov 0   ;;  %s3300_s0 = inlined_call_operand.vmem [shape: f32[2,9,9,16], index: 0, kind: input, shape index: {}]   ;;  %s3301_s1 = inlined_call_operand.vmem [shape: bf16[4,16,128], index: 1, kind: input, shape index: {}]   ;;  %s3302_s2 = inlined_call_operand.vmem [shape: f32[1,128], index: 2, kind: input, shape index: {}]   ;;  %s3303_s3 = inlined_call_operand.vmem [shape: f32[128,512], index: 3, kind: input, shape index: {}]   ;;  %s3304_s4 = inlined_call_operand.vmem [shape: f32[512,128], index: 4, kind: input, shape index: {}]   ;;  %s3305_s5 = inlined_call_operand.vmem [shape: f32[1,512], index: 5, kind: input, shape index: {}]   ;;  %s3306_s6 = inlined_call_operand.vmem [shape: f32[2,8,8,128], index: 6, kind: output, shape index: {}]  }
   0x1 LB: > { %s1763_s22 = sadd.s32 4294967295, %s2242_s21   ;;  %p1767_p0 = scmp.ge.s32.totalorder %s2242_s21, 1  ;;  %s2242_s21 = sphi %s2281_s21, %s16_s21  }
   0x2   : > { %p212_p1 = scmp.lt.s32.totalorder %s2242_s21, 3 }
   0x4   : > { %p213_p2 = pnand %p1767_p0, %p212_p1 }
   0x5   : > { %v2232_v0 = vld [vmem:[%s3301_s1 + $0x8] sm:$0xff] (!%p213_p2)   ;;  %p242_p3 = scmp.lt.s32.totalorder (!%p213_p2), %s1763_s22, 1  ;;  %v2233_v1 = vld [vmem:[%s3301_s1] sm:$0xff] (!%p213_p2)   ;;  %vm288_vm0 = vcmask (!%p213_p2), 130048   ;;  %v2234_v22 = vld [vmem:[%s3301_s1 + $0x10] sm:$0xff] (!%p213_p2)  }
   0x6   : > { %216 = sbr.rel (%p213_p2) target bundleno = 1238 (0x4d6), region = 44  ;;  %2013 = vmatprep.subr.bf16.mxu0 (!%p213_p2), %v2232_v0  ;;  %v686_v2 = vld [vmem:[%s3303_s3 + $0x8] sm:$0xff] (!%p213_p2)  ;;  %v685_v4 = vld [vmem:[%s3303_s3] sm:$0xff] (!%p213_p2)  ;;  %v2235_v61 = vld [vmem:[%s3301_s1 + $0x18] sm:$0xff] (!%p213_p2)  }
   0x7   : > { %2014 = vmatpush3.bf16.msra.mxu0 (!%p213_p2), %v2232_v0  ;;  %v690_v3 = vld [vmem:[%s3303_s3 + $0x28] sm:$0xff] (!%p213_p2)  ;;  %v689_v6 = vld [vmem:[%s3303_s3 + $0x20] sm:$0xff] (!%p213_p2) }
   0x8   : > { %2023 = vmatprep.subr.bf16.mxu0 (!%p213_p2), %v2233_v1  ;;  %v2053_v5 = vpack.c.bf16 (!%p213_p2), %v690_v3, %v686_v2  ;;  %v694_v7 = vld [vmem:[%s3303_s3 + $0x48] sm:$0xff] (!%p213_p2)  ;;  %v2055_v9 = vpack.c.bf16 (!%p213_p2), %v689_v6, %v685_v4  ;;  %v693_v11 = vld [vmem:[%s3303_s3 + $0x40] sm:$0xff] (!%p213_p2) }
   0x9   : > { %v698_v8 = vld [vmem:[%s3303_s3 + $0x68] sm:$0xff] (!%p213_p2)  ;;  %v697_v12 = vld [vmem:[%s3303_s3 + $0x60] sm:$0xff] (!%p213_p2) }
   0xa   : > { %v2057_v10 = vpack.c.bf16 (!%p213_p2), %v698_v8, %v694_v7  ;;  %2054 = vmatprep.subr.bf16.mxu1 (!%p213_p2), %v2053_v5  ;;  %v2059_v23 = vpack.c.bf16 (!%p213_p2), %v697_v12, %v693_v11  ;;  %v702_v25 = vld [vmem:[%s3303_s3 + $0x88] sm:$0xff] (!%p213_p2)  ;;  %v701_v30 = vld [vmem:[%s3303_s3 + $0x80] sm:$0xff] (!%p213_p2) }
   0xb   : > { %2056 = vmatpush1.bf16.msra.mxu1 (!%p213_p2), %v2055_v9  ;;  %v706_v29 = vld [vmem:[%s3303_s3 + $0xa8] sm:$0xff] (!%p213_p2)  ;;  %v705_v31 = vld [vmem:[%s3303_s3 + $0xa0] sm:$0xff] (!%p213_p2) }
   0xc   : > { %2058 = vmatprep.subr.bf16.mxu1 (!%p213_p2), %v2057_v10  ;;  %v2061_v32 = vpack.c.bf16 (!%p213_p2), %v706_v29, %v702_v25  ;;  %v2063_v33 = vpack.c.bf16 (!%p213_p2), %v705_v31, %v701_v30  ;;  %v710_v34 = vld [vmem:[%s3303_s3 + $0xc8] sm:$0xff] (!%p213_p2)  ;;  %v709_v36 = vld [vmem:[%s3303_s3 + $0xc0] sm:$0xff] (!%p213_p2)  ;;  %v2244_v25 = vmov (!%p213_p2), 0.0   ;;  %v691_v29 = vld [vmem:[%s3303_s3 + $0x30] sm:$0xff] (!%p213_p2) }
   0xd   : > { %s3308_s22 = smov (!%p242_p3, %s1763_s22), 1  ;;  %v714_v35 = vld [vmem:[%s3303_s3 + $0xe8] sm:$0xff]  ;;  %v713_v39 = vld [vmem:[%s3303_s3 + $0xe0] sm:$0xff]  ;;  %813 = vmatprep.mubr.f32.mxu1 %v2244_v25  ;;  %v696_v31 = vld [vmem:[%s3303_s3 + $0x58] sm:$0xff] }
   0xe   : > { %s2221_s27 = smul.u32 144, %s3308_s22  ;;  %v2065_v38 = vpack.c.bf16 %v714_v35, %v710_v34  ;;  %v718_v40 = vld [vmem:[%s3303_s3 + $0x108] sm:$0xff]  ;;  %v2067_v43 = vpack.c.bf16 %v713_v39, %v709_v36  ;;  %v717_v45 = vld [vmem:[%s3303_s3 + $0x100] sm:$0xff]  ;;  %s1880_s9 = sshll.u32 %s3308_s22, 6 }
   0xf   : > { %2060 = vmatpush1.bf16.msra.mxu1 %v2059_v23  ;;  %v722_v41 = vld [vmem:[%s3303_s3 + $0x128] sm:$0xff]  ;;  %v721_v46 = vld [vmem:[%s3303_s3 + $0x120] sm:$0xff]  ;;  %v692_v23 = vld [vmem:[%s3303_s3 + $0x38] sm:$0xff]  ;;  %s3287_s11 = scalar_lea.vmem %s3306_s6, %s1880_s9 }
  0x10   : > { %s2319_s18 = scalar_lea.vmem %s3300_s0, %s2221_s27  ;;  %2062 = vmatprep.subr.bf16.mxu1 %v2061_v32  ;;  %v2069_v44 = vpack.c.bf16 %v722_v41, %v718_v40  ;;  %v726_v47 = vld [vmem:[%s3303_s3 + $0x148] sm:$0xff]  ;;  %v2071_v53 = vpack.c.bf16 %v721_v46, %v717_v45  ;;  %v725_v55 = vld [vmem:[%s3303_s3 + $0x140] sm:$0xff]  ;;  %v700_v32 = vld [vmem:[%s3303_s3 + $0x78] sm:$0xff] }
  0x11   : > { %v267_v13 = vld [vmem:[%s2319_s18 + $0x1] sm:$0xff]  ;;  %v2329_v14 = vld [vmem:[%s2319_s18 + $0x11] sm:$0xff]  ;;  %v2089_v39 = vpack.c.bf16 %v700_v32, %v696_v31 }
  0x12   : > { %v2332_v15 = vld [vmem:[%s2319_s18 + $0x21] sm:$0xff]  ;;  %v275_v16 = vpack.c.bf16 %v2329_v14, %v267_v13  ;;  %v2336_v17 = vld [vmem:[%s2319_s18 + $0x31] sm:$0xff] }
  0x13   : > { %v2339_v18 = vld [vmem:[%s2319_s18 + $0x41] sm:$0xff]  ;;  %v2342_v19 = vld [vmem:[%s2319_s18 + $0x51] sm:$0xff]  ;;  %v276_v20 = vpack.c.bf16 %v2336_v17, %v2332_v15  ;;  %2064 = vmatpush1.bf16.msra.mxu1 %v2063_v33  ;;  %v564_v11 = vpack.c.bf16 %v2332_v15, %v2329_v14 }
  0x14   : > { %v277_v21 = vpack.c.bf16 %v2342_v19, %v2339_v18  ;;  %2015 = vmatprep.mubr.msk.bf16.mxu0 %vm288_vm0, %v275_v16  ;;  %v2354_v24 = vld [vmem:[%s2319_s18 + $0x61] sm:$0xff]  ;;  %v2361_v26 = vld [vmem:[%s2319_s18 + $0x71] sm:$0xff]  ;;  %2066 = vmatprep.subr.bf16.mxu1 %v2065_v38  ;;  %v565_v12 = vpack.c.bf16 %v2339_v18, %v2336_v17 }
  0x15   : > { %2016 = vmatmul.mubr.msk.bf16.vlgmr.msra.gmra.mrb[0].mxu0 %vm288_vm0, %v276_v20  ;;  %v253_v27 = vld [vmem:[%s2319_s18] sm:$0xff]  ;;  %v2365_v28 = vld [vmem:[%s2319_s18 + $0x10] sm:$0xff]  ;;  %v278_v37 = vpack.c.bf16 %v2361_v26, %v2354_v24  ;;  %v730_v48 = vld [vmem:[%s3303_s3 + $0x168] sm:$0xff]  ;;  %v566_v13 = vpack.c.bf16 %v2354_v24, %v2342_v19 }
  0x16   : > { %2024 = vmatpush3.bf16.msra.mxu0 %v2233_v1  ;;  %2019 = vmatprep.mubr.msk.bf16.mxu0 %vm288_vm0, %v277_v21  ;;  %v261_v42 = vpack.c.bf16 %v2365_v28, %v253_v27  ;;  %v255_v49 = vld [vmem:[%s2319_s18 + $0x20] sm:$0xff]  ;;  %v256_v50 = vld [vmem:[%s2319_s18 + $0x30] sm:$0xff]  ;;  %v2073_v54 = vpack.c.bf16 %v730_v48, %v726_v47  ;;  %v734_v58 = vld [vmem:[%s3303_s3 + $0x188] sm:$0xff] }
  0x17   : > { %2033 = vmatprep.subr.bf16.mxu0 %v2234_v22  ;;  %v257_v51 = vld [vmem:[%s2319_s18 + $0x40] sm:$0xff]  ;;  %v258_v52 = vld [vmem:[%s2319_s18 + $0x50] sm:$0xff]  ;;  %2068 = vmatpush1.bf16.msra.mxu1 %v2067_v43  ;;  %v262_v57 = vpack.c.bf16 %v256_v50, %v255_v49  ;;  %v738_v59 = vld [vmem:[%s3303_s3 + $0x1a8] sm:$0xff]  ;;  %v458_v6 = vpack.c.bf16 %v255_v49, %v2365_v28 }
  0x18   : > { %2070 = vmatprep.subr.bf16.mxu1 %v2069_v44  ;;  %v729_v56 = vld [vmem:[%s3303_s3 + $0x160] sm:$0xff]  ;;  %v263_v60 = vpack.c.bf16 %v258_v52, %v257_v51  ;;  %v2077_v63 = vpack.c.bf16 %v738_v59, %v734_v58  ;;  %v260_v3 = vld [vmem:[%s2319_s18 + $0x70] sm:$0xff]  ;;  %v459_v7 = vpack.c.bf16 %v257_v51, %v256_v50  ;;  %v742_v14 = vld [vmem:[%s3303_s3 + $0x1c8] sm:$0xff] }
  0x19   : > { %v2075_v62 = vpack.c.bf16 %v729_v56, %v725_v55  ;;  %v733_v0 = vld [vmem:[%s3303_s3 + $0x180] sm:$0xff]  ;;  %v746_v15 = vld [vmem:[%s3303_s3 + $0x1e8] sm:$0xff]  ;;  %v687_v28 = vld [vmem:[%s3303_s3 + $0x10] sm:$0xff] }
  0x1a   : > { %v737_v1 = vld [vmem:[%s3303_s3 + $0x1a0] sm:$0xff]  ;;  %v2081_v17 = vpack.c.bf16 %v746_v15, %v742_v14  ;;  %v2087_v36 = vpack.c.bf16 %v691_v29, %v687_v28  ;;  %v695_v40 = vld [vmem:[%s3303_s3 + $0x50] sm:$0xff]  ;;  %v708_v43 = vld [vmem:[%s3303_s3 + $0xb8] sm:$0xff] }
  0x1b   : > { %2072 = vmatpush1.bf16.msra.mxu1 %v2071_v53  ;;  %v259_v2 = vld [vmem:[%s2319_s18 + $0x60] sm:$0xff]  ;;  %v2079_v4 = vpack.c.bf16 %v737_v1, %v733_v0  ;;  %v699_v41 = vld [vmem:[%s3303_s3 + $0x70] sm:$0xff]  ;;  %v716_v53 = vld [vmem:[%s3303_s3 + $0xf8] sm:$0xff] }
  0x1c   : > { %2074 = vmatprep.subr.bf16.mxu1 %v2073_v54  ;;  %v264_v5 = vpack.c.bf16 %v260_v3, %v259_v2  ;;  %v460_v8 = vpack.c.bf16 %v259_v2, %v258_v52  ;;  %v1790_v9 = vld [vmem:[%s2319_s18 + $0x80] sm:$0xff]  ;;  %v2091_v44 = vpack.c.bf16 %v699_v41, %v695_v40  ;;  %v703_v49 = vld [vmem:[%s3303_s3 + $0x90] sm:$0xff]  ;;  %v712_v52 = vld [vmem:[%s3303_s3 + $0xd8] sm:$0xff]  ;;  %v1009_v41 = vlaneseq }
  0x1d   : > { %2020 = vmatmul.mubr.msk.bf16.gmra.mrb[4].mxu0 %vm288_vm0, %v278_v37  ;;  %v461_v10 = vpack.c.bf16 %v1790_v9, %v260_v3  ;;  %v1805_v16 = vld [vmem:[%s2319_s18 + $0x81] sm:$0xff]  ;;  %v707_v50 = vld [vmem:[%s3303_s3 + $0xb0] sm:$0xff]  ;;  %v2097_v59 = vpack.c.bf16 %v716_v53, %v712_v52 }
  0x1e   : > { %2025 = vmatprep.mubr.msk.bf16.mxu0 %vm288_vm0, %v261_v42  ;;  %v567_v20 = vpack.c.bf16 %v1805_v16, %v2361_v26  ;;  %v741_v18 = vld [vmem:[%s3303_s3 + $0x1c0] sm:$0xff]  ;;  %v704_v42 = vld [vmem:[%s3303_s3 + $0x98] sm:$0xff]  ;;  %v2095_v56 = vpack.c.bf16 %v707_v50, %v703_v49  ;;  %v747_v31 = vld [vmem:[%s3303_s3 + $0x1f0] sm:$0xff] }
  0x1f   : > { %2076 = vmatpush1.bf16.msra.mxu1 %v2075_v62  ;;  %v745_v19 = vld [vmem:[%s3303_s3 + $0x1e0] sm:$0xff]  ;;  %v2093_v48 = vpack.c.bf16 %v708_v43, %v704_v42  ;;  %v720_v62 = vld [vmem:[%s3303_s3 + $0x118] sm:$0xff] }
  0x20   : > { %2078 = vmatprep.subr.bf16.mxu1 %v2077_v63  ;;  %v2083_v21 = vpack.c.bf16 %v745_v19, %v741_v18  ;;  %v2481_v26 = vld [vmem:[%s3302_s2] ss:$0 sm:$0xff]  ;;  %v724_v63 = vld [vmem:[%s3303_s3 + $0x138] sm:$0xff]  ;;  %v735_v19 = vld [vmem:[%s3303_s3 + $0x190] sm:$0xff] }
  0x21   : > { %v2101_v3 = vpack.c.bf16 %v724_v63, %v720_v62  ;;  %v736_v16 = vld [vmem:[%s3303_s3 + $0x198] sm:$0xff] }
  0x23   : > { %2080 = vmatpush1.bf16.msra.mxu1 %v2079_v4  ;;  %v719_v4 = vld [vmem:[%s3303_s3 + $0x110] sm:$0xff] }
  0x24   : > { %2082 = vmatprep.subr.bf16.mxu1 %v2081_v17 }
  0x25   : > { %2026 = vmatmul.mubr.msk.bf16.vlgmr.msra.gmra.mrb[0].mxu0 %vm288_vm0, %v262_v57 }
  0x26   : > { %2034 = vmatpush3.bf16.msra.mxu0 %v2234_v22  ;;  %2029 = vmatprep.mubr.msk.bf16.mxu0 %vm288_vm0, %v263_v60  ;;  %v688_v22 = vld [vmem:[%s3303_s3 + $0x18] sm:$0xff]  ;;  %v711_v60 = vld [vmem:[%s3303_s3 + $0xd0] sm:$0xff] }
  0x27   : > { %2043 = vmatprep.subr.bf16.mxu0 %v2235_v61  ;;  %2084 = vmatpush1.bf16.msra.mxu1 %v2083_v21  ;;  %v2085_v24 = vpack.c.bf16 %v692_v23, %v688_v22  ;;  %v739_v21 = vld [vmem:[%s3303_s3 + $0x1b0] sm:$0xff]  ;;  %v744_v22 = vld [vmem:[%s3303_s3 + $0x1d8] sm:$0xff] }
  0x28   : > { %v748_v23 = vld [vmem:[%s3303_s3 + $0x1f8] sm:$0xff] }
  0x29   : > { %2086 = vmatprep.subr.bf16.mxu1 %v2085_v24  ;;  %v2111_v24 = vpack.c.bf16 %v739_v21, %v735_v19  ;;  %v2113_v29 = vpack.c.bf16 %v748_v23, %v744_v22 }
  0x2d   : > { %2030 = vmatmul.mubr.msk.bf16.gmra.mrb[4].mxu0 %vm288_vm0, %v264_v5  ;;  %v723_v5 = vld [vmem:[%s3303_s3 + $0x130] sm:$0xff] }
  0x2e   : > { %2035 = vmatprep.mubr.msk.bf16.mxu0 %vm288_vm0, %v458_v6  ;;  %v728_v6 = vld [vmem:[%s3303_s3 + $0x158] sm:$0xff] }
  0x35   : > { %2036 = vmatmul.mubr.msk.bf16.vlgmr.msra.gmra.mrb[0].mxu0 %vm288_vm0, %v459_v7  ;;  %v732_v7 = vld [vmem:[%s3303_s3 + $0x178] sm:$0xff] }
  0x36   : > { %2044 = vmatpush3.bf16.msra.mxu0 %v2235_v61  ;;  %2039 = vmatprep.mubr.msk.bf16.mxu0 %vm288_vm0, %v460_v8  ;;  %v715_v61 = vld [vmem:[%s3303_s3 + $0xf0] sm:$0xff]  ;;  %v2103_v8 = vpack.c.bf16 %v723_v5, %v719_v4 }
  0x37   : > { %v2099_v0 = vpack.c.bf16 %v715_v61, %v711_v60 }
  0x3d   : > { %2040 = vmatmul.mubr.msk.bf16.gmra.mrb[4].mxu0 %vm288_vm0, %v461_v10 }
  0x3e   : > { %2045 = vmatprep.mubr.msk.bf16.mxu0 %vm288_vm0, %v564_v11  ;;  %v2105_v11 = vpack.c.bf16 %v732_v7, %v728_v6 }
  0x45   : > { %2046 = vmatmul.mubr.msk.bf16.vlgmr.msra.gmra.mrb[0].mxu0 %vm288_vm0, %v565_v12  ;;  %v727_v12 = vld [vmem:[%s3303_s3 + $0x150] sm:$0xff] }
  0x46   : > { %2049 = vmatprep.mubr.msk.bf16.mxu0 %vm288_vm0, %v566_v13  ;;  %v731_v13 = vld [vmem:[%s3303_s3 + $0x170] sm:$0xff] }
  0x47   : > { %v2107_v14 = vpack.c.bf16 %v731_v13, %v727_v12 }
  0x4d   : > { %2050 = vmatmul.mubr.msk.bf16.gmra.mrb[4].mxu0 %vm288_vm0, %v567_v20  ;;  %v740_v20 = vld [vmem:[%s3303_s3 + $0x1b8] sm:$0xff] }
  0x4e   : > { %v2109_v18 = vpack.c.bf16 %v740_v20, %v736_v16 }
 0x118   : > { %v2047_v27 = vpop.f32.mrb[0].mxu0 }
 0x119   : > { %v623_v30 = vpop.f32.mrb[1].mxu0  ;;  %v2518_v45 = vadd.f32 %v2047_v27, %v2481_v26 }
 0x11a   : > { %v2496_v33 = vadd.f32 %v2481_v26, %v623_v30  ;;  %v2048_v34 = vpop.f32.mrb[2].mxu0  ;;  %v743_v30 = vld [vmem:[%s3303_s3 + $0x1d0] sm:$0xff] }
 0x11b   : > { %v626_v35 = vpop.f32.mrb[3].mxu0  ;;  %v679_v57 = vmax.f32 %v2518_v45, 0.0  ;;  %v2538_v58 = vadd.f32 %v2048_v34, %v2481_v26  ;;  %v2115_v32 = vpack.c.bf16 %v747_v31, %v743_v30 }
 0x11c   : > { %v677_v37 = vmax.f32 %v2496_v33, 0.0  ;;  %v2500_v38 = vadd.f32 %v2481_v26, %v626_v35 }
 0x11d   : > { %v680_v1 = vmax.f32 %v2538_v58, 0.0 }
 0x11e   : > { %814 = vmatmul.mubr.f32.vlgmr.msra.gmra.mrb[0].mxu1 %v677_v37  ;;  %v678_v46 = vmax.f32 %v2500_v38, 0.0 }
 0x11f   : > { %2088 = vmatpush1.bf16.msra.mxu1 %v2087_v36  ;;  %819 = vmatprep.mubr.f32.mxu1 %v2244_v25 }
 0x120   : > { %v2051_v47 = vpop.f32.mrb[4].mxu0  ;;  %2090 = vmatprep.subr.bf16.mxu1 %v2089_v39 }
 0x121   : > { %v639_v51 = vpop.f32.mrb[5].mxu0  ;;  %v675_v15 = vadd.f32 %v2051_v47, %v2481_v26 }
 0x122   : > { %v2052_v54 = vpop.f32.mrb[6].mxu0  ;;  %820 = vmatmul.mubr.f32.gmra.mrb[2].mxu1 %v678_v46  ;;  %v673_v2 = vadd.f32 %v2481_v26, %v639_v51 }
 0x123   : > { %2092 = vmatpush1.bf16.msra.mxu1 %v2091_v44  ;;  %v642_v55 = vpop.f32.mrb[7].mxu0  ;;  %825 = vmatprep.mubr.f32.mxu1 %v2244_v25  ;;  %v683_v27 = vmax.f32 %v675_v15, 0.0  ;;  %v676_v28 = vadd.f32 %v2052_v54, %v2481_v26  ;;  %v1010_v44 = vshrl.u32 %v1009_v41, 7 }
 0x124   : > { %2094 = vmatprep.subr.bf16.mxu1 %v2093_v48  ;;  %v681_v9 = vmax.f32 %v673_v2, 0.0  ;;  %v674_v10 = vadd.f32 %v2481_v26, %v642_v55 }
 0x125   : > { %v684_v34 = vmax.f32 %v676_v28, 0.0  ;;  %v1011_v47 = vsub.s32 0, %v1010_v44  ;;  %v1015_v48 = vsub.s32 1, %v1010_v44  ;;  %v1019_v51 = vsub.s32 2, %v1010_v44 }
 0x126   : > { %826 = vmatmul.mubr.f32.gmra.mrb[4].mxu1 %v679_v57  ;;  %v682_v17 = vmax.f32 %v674_v10, 0.0 }
 0x127   : > { %2096 = vmatpush1.bf16.msra.mxu1 %v2095_v56  ;;  %831 = vmatprep.mubr.f32.mxu1 %v2244_v25 }
 0x128   : > { %2098 = vmatprep.subr.bf16.mxu1 %v2097_v59 }
 0x12a   : > { %832 = vmatmul.mubr.f32.gmra.mrb[6].mxu1 %v680_v1 }
 0x12b   : > { %2100 = vmatpush1.bf16.msra.mxu1 %v2099_v0  ;;  %837 = vmatprep.mubr.f32.mxu1 %v2244_v25 }
 0x12c   : > { %2102 = vmatprep.subr.bf16.mxu1 %v2101_v3 }
 0x12e   : > { %838 = vmatmul.mubr.f32.gmra.mrb[8].mxu1 %v681_v9 }
 0x12f   : > { %2104 = vmatpush1.bf16.msra.mxu1 %v2103_v8  ;;  %843 = vmatprep.mubr.f32.mxu1 %v2244_v25 }
 0x130   : > { %2106 = vmatprep.subr.bf16.mxu1 %v2105_v11 }
 0x132   : > { %844 = vmatmul.mubr.f32.gmra.mrb[10].mxu1 %v682_v17 }
 0x133   : > { %2108 = vmatpush1.bf16.msra.mxu1 %v2107_v14  ;;  %849 = vmatprep.mubr.f32.mxu1 %v2244_v25 }
 0x134   : > { %2110 = vmatprep.subr.bf16.mxu1 %v2109_v18 }
 0x136   : > { %850 = vmatmul.mubr.f32.gmra.mrb[12].mxu1 %v683_v27 }
 0x137   : > { %2112 = vmatpush1.bf16.msra.mxu1 %v2111_v24  ;;  %855 = vmatprep.mubr.f32.mxu1 %v2244_v25 }
 0x138   : > { %2114 = vmatprep.subr.bf16.mxu1 %v2113_v29 }
 0x13a   : > { %856 = vmatmul.mubr.f32.gmra.mrb[14].mxu1 %v684_v34 }
 0x13b   : > { %2116 = vmatpush1.bf16.msra.mxu1 %v2115_v32  ;;  %926 = vmatprep.mubr.f32.mxu1 %v2244_v25 }
 0x13e   : > { %927 = vmatmul.mubr.f32.vlgmr.msra.gmra.mrb[16].mxu1 %v677_v37 }
 0x13f   : > { %932 = vmatprep.mubr.f32.mxu1 %v2244_v25 }
 0x142   : > { %933 = vmatmul.mubr.f32.gmra.mrb[18].mxu1 %v678_v46 }
 0x143   : > { %938 = vmatprep.mubr.f32.mxu1 %v2244_v25 }
 0x146   : > { %939 = vmatmul.mubr.f32.gmra.mrb[20].mxu1 %v679_v57  ;;  %v1023_v57 = vsub.s32 3, %v1010_v44 }
 0x147   : > { %944 = vmatprep.mubr.f32.mxu1 %v2244_v25 }
 0x14a   : > { %945 = vmatmul.mubr.f32.gmra.mrb[22].mxu1 %v680_v1 }
 0x14b   : > { %950 = vmatprep.mubr.f32.mxu1 %v2244_v25 }
 0x14e   : > { %951 = vmatmul.mubr.f32.gmra.mrb[24].mxu1 %v681_v9 }
 0x14f   : > { %956 = vmatprep.mubr.f32.mxu1 %v2244_v25 }
 0x152   : > { %957 = vmatmul.mubr.f32.gmra.mrb[26].mxu1 %v682_v17 }
 0x153   : > { %962 = vmatprep.mubr.f32.mxu1 %v2244_v25 }
 0x156   : > { %963 = vmatmul.mubr.f32.gmra.mrb[28].mxu1 %v683_v27 }
 0x157   : > { %968 = vmatprep.mubr.f32.mxu1 %v2244_v25  ;;  %v975_v25 = vld [vmem:[%s3305_s5] sm:$0xf] }
 0x158   : > { %v2630_v53 = vrot.slane %v975_v25, %v1011_v47  ;;  %v2632_v55 = vrot.slane %v975_v25, %v1015_v48  ;;  %v2638_v59 = vrot.slane %v975_v25, %v1019_v51  ;;  %v2646_v1 = vrot.slane %v975_v25, %v1023_v57 }
 0x15a   : > { %969 = vmatmul.mubr.f32.gmra.mrb[30].mxu1 %v684_v34 }
 0x1f1   : > { %v815_v26 = vpop.f32.mrb[0].mxu1 }
 0x1f2   : > { %v817_v33 = vpop.f32.mrb[1].mxu1  ;;  %v976_v52 = vmul.f32 2.0, %v815_v26 }
 0x1f3   : > { %v977_v54 = vmul.f32 2.0, %v817_v33 }
 0x1f4   : > { %v2641_v60 = vsub.f32 %v2630_v53, %v976_v52 }
 0x1f5   : > { %v821_v35 = vpop.f32.mrb[2].mxu1  ;;  %v2644_v61 = vsub.f32 %v2632_v55, %v977_v54 }
 0x1f6   : > { %v823_v36 = vpop.f32.mrb[3].mxu1  ;;  %v980_v62 = vmul.f32 2.0, %v821_v35 }
 0x1f7   : > { %v981_v63 = vmul.f32 2.0, %v823_v36  ;;  %v1061_v10 = vmin.f32 %v2641_v60, %v2644_v61 }
 0x1f8   : > { %v2649_v7 = vsub.f32 %v2630_v53, %v980_v62 }
 0x1f9   : > { %v827_v37 = vpop.f32.mrb[4].mxu1  ;;  %v2652_v8 = vsub.f32 %v2632_v55, %v981_v63 }
 0x1fa   : > { %v829_v38 = vpop.f32.mrb[5].mxu1  ;;  %v984_v2 = vmul.f32 2.0, %v827_v37 }
 0x1fb   : > { %v985_v5 = vmul.f32 2.0, %v829_v38  ;;  %v1066_v21 = vmin.f32 %v2649_v7, %v2652_v8 }
 0x1fc   : > { %v2663_v13 = vsub.f32 %v2630_v53, %v984_v2 }
 0x1fd   : > { %v833_v39 = vpop.f32.mrb[6].mxu1  ;;  %v2667_v15 = vsub.f32 %v2632_v55, %v985_v5 }
 0x1fe   : > { %v835_v40 = vpop.f32.mrb[7].mxu1  ;;  %v988_v17 = vmul.f32 2.0, %v833_v39 }
 0x1ff   : > { %v989_v18 = vmul.f32 2.0, %v835_v40  ;;  %v1071_v26 = vmin.f32 %v2663_v13, %v2667_v15 }
 0x200   : > { %v2680_v31 = vsub.f32 %v2630_v53, %v988_v17 }
 0x201   : > { %v839_v42 = vpop.f32.mrb[8].mxu1  ;;  %v2683_v32 = vsub.f32 %v2632_v55, %v989_v18 }
 0x202   : > { %v841_v43 = vpop.f32.mrb[9].mxu1  ;;  %v992_v33 = vmul.f32 2.0, %v839_v42 }
 0x203   : > { %v993_v35 = vmul.f32 2.0, %v841_v43  ;;  %v1076_v25 = vmin.f32 %v2680_v31, %v2683_v32 }
 0x204   : > { %v2699_v51 = vsub.f32 %v2630_v53, %v992_v33 }
 0x205   : > { %v845_v45 = vpop.f32.mrb[10].mxu1  ;;  %v2702_v52 = vsub.f32 %v2632_v55, %v993_v35 }
 0x206   : > { %v2621_v46 = vpop.f32.mrb[11].mxu1  ;;  %v996_v40 = vmul.f32 2.0, %v845_v45 }
 0x207   : > { %v997_v42 = vmul.f32 2.0, %v2621_v46 }
 0x208   : > { %v2712_v63 = vsub.f32 %v2630_v53, %v996_v40 }
 0x209   : > { %v2626_v49 = vpop.f32.mrb[12].mxu1 }
 0x20a   : > { %v2628_v50 = vpop.f32.mrb[13].mxu1 }
 0x20b   : > { %v1001_v5 = vmul.f32 2.0, %v2628_v50 }
 0x20d   : > { %v2634_v56 = vpop.f32.mrb[14].mxu1 }
 0x20e   : > { %v2636_v58 = vpop.f32.mrb[15].mxu1 }
 0x211   : > { %v928_v0 = vpop.f32.mrb[16].mxu1 }
 0x212   : > { %v978_v3 = vmul.f32 2.0, %v928_v0  ;;  %v930_v4 = vpop.f32.mrb[17].mxu1 }
 0x213   : > { %v979_v6 = vmul.f32 2.0, %v930_v4  ;;  %v1000_v4 = vmul.f32 2.0, %v2626_v49 }
 0x214   : > { %v2655_v9 = vsub.f32 %v2638_v59, %v978_v3  ;;  %v2716_v3 = vsub.f32 %v2632_v55, %v997_v42 }
 0x215   : > { %v934_v11 = vpop.f32.mrb[18].mxu1  ;;  %v2660_v12 = vsub.f32 %v2646_v1, %v979_v6 }
 0x216   : > { %v982_v16 = vmul.f32 2.0, %v934_v11  ;;  %v936_v20 = vpop.f32.mrb[19].mxu1  ;;  %v1062_v14 = vmin.f32 %v1061_v10, %v2655_v9  ;;  %v1081_v10 = vmin.f32 %v2699_v51, %v2702_v52  ;;  %v1086_v50 = vmin.f32 %v2712_v63, %v2716_v3 }
 0x217   : > { %v983_v19 = vmul.f32 2.0, %v936_v20 }
 0x218   : > { %v2672_v22 = vsub.f32 %v2638_v59, %v982_v16  ;;  %v1063_v23 = vmin.f32 %v1062_v14, %v2660_v12 }
 0x219   : > { %v2676_v24 = vsub.f32 %v2646_v1, %v983_v19  ;;  %v940_v27 = vpop.f32.mrb[20].mxu1  ;;  %v2733_v19 = vsub.f32 %v2630_v53, %v1000_v4 }
 0x21a   : > { %v986_v28 = vmul.f32 2.0, %v940_v27  ;;  %1064 = vmin.xlane.f32.xlu0 %v1063_v23  ;;  %v942_v29 = vpop.f32.mrb[21].mxu1  ;;  %v1067_v30 = vmin.f32 %v1066_v21, %v2672_v22  ;;  %v2736_v21 = vsub.f32 %v2632_v55, %v1001_v5  ;;  %v1004_v27 = vmul.f32 2.0, %v2634_v56 }
 0x21b   : > { %v987_v34 = vmul.f32 2.0, %v942_v29  ;;  %v2776_v5 = vand.u32 127, %v1009_v41 }
 0x21c   : > { %v2688_v36 = vsub.f32 %v2638_v59, %v986_v28  ;;  %v1068_v37 = vmin.f32 %v1067_v30, %v2676_v24  ;;  %v1005_v28 = vmul.f32 2.0, %v2636_v58  ;;  %v2751_v58 = vsub.f32 %v2630_v53, %v1004_v27 }
 0x21d   : > { %v946_v38 = vpop.f32.mrb[22].mxu1  ;;  %v2692_v39 = vsub.f32 %v2646_v1, %v987_v34  ;;  %v2790_v41 = vadd.s32 384, %v2776_v5 }
 0x21e   : > { %v990_v44 = vmul.f32 2.0, %v946_v38  ;;  %1069 = vmin.xlane.f32.xlu0 %v1068_v37  ;;  %v948_v47 = vpop.f32.mrb[23].mxu1  ;;  %v1072_v48 = vmin.f32 %v1071_v26, %v2688_v36  ;;  %v1091_v38 = vmin.f32 %v2733_v19, %v2736_v21  ;;  %v2754_v40 = vsub.f32 %v2632_v55, %v1005_v28 }
 0x21f   : > { %v991_v43 = vmul.f32 2.0, %v948_v47 }
 0x220   : > { %v2705_v54 = vsub.f32 %v2638_v59, %v990_v44  ;;  %v1073_v45 = vmin.f32 %v1072_v48, %v2692_v39  ;;  %v1096_v53 = vmin.f32 %v2751_v58, %v2754_v40 }
 0x221   : > { %v2709_v57 = vsub.f32 %v2646_v1, %v991_v43  ;;  %v952_v62 = vpop.f32.mrb[24].mxu1 }
 0x222   : > { %v994_v46 = vmul.f32 2.0, %v952_v62  ;;  %1074 = vmin.xlane.f32.xlu1 %v1073_v45  ;;  %v954_v0 = vpop.f32.mrb[25].mxu1  ;;  %v1077_v2 = vmin.f32 %v1076_v25, %v2705_v54 }
 0x223   : > { %v995_v6 = vmul.f32 2.0, %v954_v0 }
 0x224   : > { %v2723_v11 = vsub.f32 %v2638_v59, %v994_v46  ;;  %v1078_v16 = vmin.f32 %v1077_v2, %v2709_v57 }
 0x225   : > { %v2727_v20 = vsub.f32 %v2646_v1, %v995_v6  ;;  %v958_v14 = vpop.f32.mrb[26].mxu1  ;;  %v2779_v6 = vadd.s32 128, %v2776_v5 }
 0x226   : > { %v998_v17 = vmul.f32 2.0, %v958_v14  ;;  %1079 = vmin.xlane.f32.xlu1 %v1078_v16  ;;  %v960_v18 = vpop.f32.mrb[27].mxu1  ;;  %v1082_v49 = vmin.f32 %v1081_v10, %v2723_v11 }
 0x227   : > { %v999_v23 = vmul.f32 2.0, %v960_v18 }
 0x228   : > { %v2741_v29 = vsub.f32 %v2638_v59, %v998_v17  ;;  %v1083_v30 = vmin.f32 %v1082_v49, %v2727_v20 }
 0x229   : > { %v2745_v34 = vsub.f32 %v2646_v1, %v999_v23  ;;  %v964_v26 = vpop.f32.mrb[28].mxu1 }
 0x22a   : > { %v1002_v33 = vmul.f32 2.0, %v964_v26  ;;  %1084 = vmin.xlane.f32.xlu0 %v1083_v30  ;;  %v966_v35 = vpop.f32.mrb[29].mxu1  ;;  %v1087_v37 = vmin.f32 %v1086_v50, %v2741_v29 }
 0x22b   : > { %v1003_v56 = vmul.f32 2.0, %v966_v35 }
 0x22c   : > { %v2757_v44 = vsub.f32 %v2638_v59, %v1002_v33  ;;  %v1088_v47 = vmin.f32 %v1087_v37, %v2745_v34 }
 0x22d   : > { %v2761_v48 = vsub.f32 %v2646_v1, %v1003_v56  ;;  %v970_v25 = vpop.f32.mrb[30].mxu1 }
 0x22e   : > { %v1006_v42 = vmul.f32 2.0, %v970_v25  ;;  %1089 = vmin.xlane.f32.xlu1 %v1088_v47  ;;  %v972_v43 = vpop.f32.mrb[31].mxu1  ;;  %v1092_v45 = vmin.f32 %v1091_v38, %v2757_v44 }
 0x22f   : > { %v1007_v62 = vmul.f32 2.0, %v972_v43 }
 0x230   : > { %v2767_v55 = vsub.f32 %v2638_v59, %v1006_v42  ;;  %v1093_v46 = vmin.f32 %v1092_v45, %v2761_v48  ;;  %v2782_v59 = vadd.s32 256, %v2776_v5 }
 0x231   : > { %v2771_v0 = vsub.f32 %v2646_v1, %v1007_v62 }
 0x232   : > { %1094 = vmin.xlane.f32.xlu0 %v1093_v46  ;;  %v1097_v2 = vmin.f32 %v1096_v53, %v2767_v55 }
 0x234   : > { %v1098_v4 = vmin.f32 %v1097_v2, %v2771_v0 }
 0x236   : > { %1099 = vmin.xlane.f32.xlu1 %v1098_v4 }
 0x2a7   : > { %v1065_v10 = vpop.xlane.xlu0 %1064 }
 0x2a8   : > { %vm1106_vm1 = vcmp.eq.f32.partialorder %v2641_v60, %v1065_v10  ;;  %vm1107_vm2 = vcmp.eq.f32.partialorder %v2644_v61, %v1065_v10  ;;  %vm1108_vm3 = vcmp.eq.f32.partialorder %v2655_v9, %v1065_v10  ;;  %vm1109_vm5 = vcmp.eq.f32.partialorder %v2660_v12, %v1065_v10 }
 0x2a9   : > { %v1138_v1 = vsel %vm1106_vm1, %v2776_v5, 512  ;;  %v1139_v16 = vsel %vm1107_vm2, %v2779_v6, 512  ;;  %v1140_v18 = vsel %vm1108_vm3, %v2782_v59, 512  ;;  %v1141_v9 = vsel %vm1109_vm5, %v2790_v41, 512 }
 0x2aa   : > { %vm1170_vm4 = vcmp.lt.s32.totalorder %v1138_v1, %v1139_v16 }
 0x2ab   : > { %v1070_v14 = vpop.xlane.xlu0 %1069  ;;  %v1171_v17 = vsel %vm1170_vm4, %v1138_v1, %v1139_v16 }
 0x2ac   : > { %vm1110_vm6 = vcmp.eq.f32.partialorder %v2649_v7, %v1070_v14  ;;  %vm1111_vm7 = vcmp.eq.f32.partialorder %v2652_v8, %v1070_v14  ;;  %vm1112_vm8 = vcmp.eq.f32.partialorder %v2672_v22, %v1070_v14  ;;  %vm1172_vm9 = vcmp.lt.s32.totalorder %v1171_v17, %v1140_v18 }
 0x2ad   : > { %v1142_v60 = vsel %vm1110_vm6, %v2776_v5, 512  ;;  %v1143_v61 = vsel %vm1111_vm7, %v2779_v6, 512  ;;  %v1173_v49 = vsel %vm1172_vm9, %v1171_v17, %v1140_v18  ;;  %vm1113_vm12 = vcmp.eq.f32.partialorder %v2676_v24, %v1070_v14 }
 0x2ae   : > { %vm1190_vm10 = vcmp.lt.s32.totalorder %v1142_v60, %v1143_v61  ;;  %vm1174_vm11 = vcmp.lt.s32.totalorder %v1173_v49, %v1141_v9  ;;  %v1144_v7 = vsel %vm1112_vm8, %v2782_v59, 512  ;;  %v1145_v28 = vsel %vm1113_vm12, %v2790_v41, 512 }
 0x2af   : > { %v1075_v12 = vpop.xlane.xlu1 %1074  ;;  %v1191_v50 = vsel %vm1190_vm10, %v1142_v60, %v1143_v61  ;;  %v2807_v23 = vsel %vm1174_vm11, %v1173_v49, %v1141_v9 }
 0x2b0   : > { %vm1114_vm13 = vcmp.eq.f32.partialorder %v2663_v13, %v1075_v12  ;;  %vm1115_vm14 = vcmp.eq.f32.partialorder %v2667_v15, %v1075_v12  ;;  %vm1116_vm15 = vcmp.eq.f32.partialorder %v2688_v36, %v1075_v12  ;;  %v1177_v27 = vshra.s32 %v2807_v23, 16 }
 0x2b1   : > { %v1146_v8 = vsel %vm1114_vm13, %v2776_v5, 512  ;;  %v1147_v22 = vsel %vm1115_vm14, %v2779_v6, 512  ;;  %vm1192_vm1 = vcmp.lt.s32.totalorder %v1191_v50, %v1144_v7  ;;  %vm1117_vm2 = vcmp.eq.f32.partialorder %v2692_v39, %v1075_v12 }
 0x2b2   : > { %vm1210_vm0 = vcmp.lt.s32.totalorder %v1146_v8, %v1147_v22  ;;  %v1193_v13 = vsel %vm1192_vm1, %v1191_v50, %v1144_v7  ;;  %v1148_v15 = vsel %vm1116_vm15, %v2782_v59, 512  ;;  %v2819_v39 = vcvt.s32.f32 %v1177_v27 }
 0x2b3   : > { %v1080_v24 = vpop.xlane.xlu1 %1079  ;;  %v1211_v30 = vsel %vm1210_vm0, %v1146_v8, %v1147_v22  ;;  %vm1194_vm8 = vcmp.lt.s32.totalorder %v1193_v13, %v1145_v28  ;;  %v1149_v33 = vsel %vm1117_vm2, %v2790_v41, 512 }
 0x2b4   : > { %vm1118_vm3 = vcmp.eq.f32.partialorder %v2680_v31, %v1080_v24  ;;  %vm1119_vm4 = vcmp.eq.f32.partialorder %v2683_v32, %v1080_v24  ;;  %vm1120_vm5 = vcmp.eq.f32.partialorder %v2705_v54, %v1080_v24  ;;  %vm1121_vm6 = vcmp.eq.f32.partialorder %v2709_v57, %v1080_v24  ;;  %1180 = vmin.xlane.f32.xlu0 %v2819_v39 }
 0x2b5   : > { %v1150_v36 = vsel %vm1118_vm3, %v2776_v5, 512  ;;  %v1151_v26 = vsel %vm1119_vm4, %v2779_v6, 512  ;;  %vm1212_vm9 = vcmp.lt.s32.totalorder %v1211_v30, %v1148_v15  ;;  %v1152_v35 = vsel %vm1120_vm5, %v2782_v59, 512 }
 0x2b6   : > { %vm1230_vm7 = vcmp.lt.s32.totalorder %v1150_v36, %v1151_v26  ;;  %v2824_v32 = vsel %vm1194_vm8, %v1193_v13, %v1145_v28  ;;  %v1213_v54 = vsel %vm1212_vm9, %v1211_v30, %v1148_v15  ;;  %v1153_v38 = vsel %vm1121_vm6, %v2790_v41, 512 }
 0x2b7   : > { %v1085_v31 = vpop.xlane.xlu0 %1084  ;;  %v1231_v37 = vsel %vm1230_vm7, %v1150_v36, %v1151_v26  ;;  %v1197_v25 = vshra.s32 %v2824_v32, 16  ;;  %vm1214_vm15 = vcmp.lt.s32.totalorder %v1213_v54, %v1149_v33  ;;  %v1443_v36 = vld [vmem:[%s3304_s4 + $0x88] sm:$0xff]  ;;  %v1426_v26 = vld [vmem:[%s3304_s4] sm:$0xff] }
 0x2b8   : > { %vm1122_vm10 = vcmp.eq.f32.partialorder %v2699_v51, %v1085_v31  ;;  %vm1123_vm11 = vcmp.eq.f32.partialorder %v2702_v52, %v1085_v31  ;;  %vm1124_vm12 = vcmp.eq.f32.partialorder %v2723_v11, %v1085_v31  ;;  %vm1125_vm13 = vcmp.eq.f32.partialorder %v2727_v20, %v1085_v31  ;;  %v1444_v31 = vld [vmem:[%s3304_s4 + $0x90] sm:$0xff] }
 0x2b9   : > { %v1154_v56 = vsel %vm1122_vm10, %v2776_v5, 512  ;;  %v1155_v47 = vsel %vm1123_vm11, %v2779_v6, 512  ;;  %v1156_v42 = vsel %vm1124_vm12, %v2782_v59, 512  ;;  %vm1232_vm0 = vcmp.lt.s32.totalorder %v1231_v37, %v1152_v35 }
 0x2ba   : > { %vm1250_vm14 = vcmp.lt.s32.totalorder %v1154_v56, %v1155_v47  ;;  %v2837_v51 = vcvt.s32.f32 %v1197_v25  ;;  %v2839_v11 = vsel %vm1214_vm15, %v1213_v54, %v1149_v33  ;;  %v1233_v57 = vsel %vm1232_vm0, %v1231_v37, %v1152_v35  ;;  %v1427_v35 = vld [vmem:[%s3304_s4 + $0x8] sm:$0xff]  ;;  %v1445_v54 = vld [vmem:[%s3304_s4 + $0x98] sm:$0xff]  ;;  %v1474_v25 = vld [vmem:[%s3304_s4 + $0x180] sm:$0xff] }
 0x2bb   : > { %v1090_v52 = vpop.xlane.xlu1 %1089  ;;  %v1251_v43 = vsel %vm1250_vm14, %v1154_v56, %v1155_v47  ;;  %v1157_v45 = vsel %vm1125_vm13, %v2790_v41, 512  ;;  %v1217_v46 = vshra.s32 %v2839_v11, 16  ;;  %vm1234_vm6 = vcmp.lt.s32.totalorder %v1233_v57, %v1153_v38  ;;  %v1428_v56 = vld [vmem:[%s3304_s4 + $0x10] sm:$0xff]  ;;  %v1429_v47 = vld [vmem:[%s3304_s4 + $0x18] sm:$0xff] }
 0x2bc   : > { %vm1126_vm1 = vcmp.eq.f32.partialorder %v2712_v63, %v1090_v52  ;;  %vm1127_vm2 = vcmp.eq.f32.partialorder %v2716_v3, %v1090_v52  ;;  %vm1128_vm3 = vcmp.eq.f32.partialorder %v2741_v29, %v1090_v52  ;;  %1200 = vmin.xlane.f32.xlu1 %v2837_v51  ;;  %vm1129_vm4 = vcmp.eq.f32.partialorder %v2745_v34, %v1090_v52  ;;  %v1458_v52 = vld [vmem:[%s3304_s4 + $0x100] sm:$0xff] }
 0x2bd   : > { %v1158_v62 = vsel %vm1126_vm1, %v2776_v5, 512  ;;  %v1159_v53 = vsel %vm1127_vm2, %v2779_v6, 512  ;;  %v1160_v63 = vsel %vm1128_vm3, %v2782_v59, 512  ;;  %vm1252_vm7 = vcmp.lt.s32.totalorder %v1251_v43, %v1156_v42 }
 0x2be   : > { %vm1270_vm5 = vcmp.lt.s32.totalorder %v1158_v62, %v1159_v53  ;;  %v2853_v3 = vcvt.s32.f32 %v1217_v46  ;;  %v2855_v20 = vsel %vm1234_vm6, %v1233_v57, %v1153_v38  ;;  %v1253_v2 = vsel %vm1252_vm7, %v1251_v43, %v1156_v42  ;;  %v1475_v42 = vld [vmem:[%s3304_s4 + $0x188] sm:$0xff] }
 0x2bf   : > { %v1095_v29 = vpop.xlane.xlu0 %1094  ;;  %v1271_v4 = vsel %vm1270_vm5, %v1158_v62, %v1159_v53  ;;  %v1161_v10 = vsel %vm1129_vm4, %v2790_v41, 512  ;;  %v1237_v14 = vshra.s32 %v2855_v20, 16  ;;  %vm1254_vm13 = vcmp.lt.s32.totalorder %v1253_v2, %v1157_v45  ;;  %v1459_v57 = vld [vmem:[%s3304_s4 + $0x108] sm:$0xff]  ;;  %v1446_v53 = vld [vmem:[%s3304_s4 + $0xa0] sm:$0xff] }
 0x2c0   : > { %vm1130_vm8 = vcmp.eq.f32.partialorder %v2733_v19, %v1095_v29  ;;  %vm1131_vm9 = vcmp.eq.f32.partialorder %v2736_v21, %v1095_v29  ;;  %vm1132_vm10 = vcmp.eq.f32.partialorder %v2757_v44, %v1095_v29  ;;  %1220 = vmin.xlane.f32.xlu0 %v2853_v3  ;;  %vm1133_vm11 = vcmp.eq.f32.partialorder %v2761_v48, %v1095_v29  ;;  %v1447_v46 = vld [vmem:[%s3304_s4 + $0xa8] sm:$0xff] }
 0x2c1   : > { %v1162_v1 = vsel %vm1130_vm8, %v2776_v5, 512  ;;  %v1163_v16 = vsel %vm1131_vm9, %v2779_v6, 512  ;;  %v1164_v19 = vsel %vm1132_vm10, %v2782_v59, 512  ;;  %vm1272_vm14 = vcmp.lt.s32.totalorder %v1271_v4, %v1160_v63 }
 0x2c2   : > { %vm1290_vm12 = vcmp.lt.s32.totalorder %v1162_v1, %v1163_v16  ;;  %v2869_v21 = vcvt.s32.f32 %v1237_v14  ;;  %v2871_v34 = vsel %vm1254_vm13, %v1253_v2, %v1157_v45  ;;  %v1273_v17 = vsel %vm1272_vm14, %v1271_v4, %v1160_v63  ;;  %v1430_v63 = vld [vmem:[%s3304_s4 + $0x20] sm:$0xff]  ;;  %v1431_v2 = vld [vmem:[%s3304_s4 + $0x28] sm:$0xff]  ;;  %v1476_v4 = vld [vmem:[%s3304_s4 + $0x190] sm:$0xff] }
 0x2c3   : > { %v1100_v44 = vpop.xlane.xlu1 %1099  ;;  %v1291_v18 = vsel %vm1290_vm12, %v1162_v1, %v1163_v16  ;;  %v1165_v60 = vsel %vm1133_vm11, %v2790_v41, 512  ;;  %v1257_v49 = vshra.s32 %v2871_v34, 16  ;;  %vm1274_vm4 = vcmp.lt.s32.totalorder %v1273_v17, %v1161_v10  ;;  %v1460_v16 = vld [vmem:[%s3304_s4 + $0x110] sm:$0xff]  ;;  %v1461_v14 = vld [vmem:[%s3304_s4 + $0x118] sm:$0xff] }
 0x2c4   : > { %vm1134_vm15 = vcmp.eq.f32.partialorder %v2751_v58, %v1100_v44  ;;  %vm1135_vm0 = vcmp.eq.f32.partialorder %v2754_v40, %v1100_v44  ;;  %vm1136_vm1 = vcmp.eq.f32.partialorder %v2767_v55, %v1100_v44  ;;  %1240 = vmin.xlane.f32.xlu1 %v2869_v21  ;;  %vm1137_vm2 = vcmp.eq.f32.partialorder %v2771_v0, %v1100_v44  ;;  %v1442_v0 = vld [vmem:[%s3304_s4 + $0x80] sm:$0xff] }
 0x2c5   : > { %v1166_v61 = vsel %vm1134_vm15, %v2776_v5, 512  ;;  %v1167_v9 = vsel %vm1135_vm0, %v2779_v6, 512  ;;  %v1168_v58 = vsel %vm1136_vm1, %v2782_v59, 512  ;;  %vm1292_vm5 = vcmp.lt.s32.totalorder %v1291_v18, %v1164_v19 }
 0x2c6   : > { %vm1310_vm3 = vcmp.lt.s32.totalorder %v1166_v61, %v1167_v9  ;;  %v2885_v40 = vcvt.s32.f32 %v1257_v49  ;;  %v2887_v55 = vsel %vm1274_vm4, %v1273_v17, %v1161_v10  ;;  %v1293_v48 = vsel %vm1292_vm5, %v1291_v18, %v1164_v19  ;;  %v1477_v10 = vld [vmem:[%s3304_s4 + $0x198] sm:$0xff]  ;;  %v1448_v19 = vld [vmem:[%s3304_s4 + $0xb0] sm:$0xff] }
 0x2c7   : > { %v1311_v12 = vsel %vm1310_vm3, %v1166_v61, %v1167_v9  ;;  %v1277_v50 = vshra.s32 %v2887_v55, 16  ;;  %vm1294_vm6 = vcmp.lt.s32.totalorder %v1293_v48, %v1165_v60  ;;  %v1169_v8 = vsel %vm1137_vm2, %v2790_v41, 512  ;;  %v1449_v17 = vld [vmem:[%s3304_s4 + $0xb8] sm:$0xff]  ;;  %v1479_v61 = vld [vmem:[%s3304_s4 + $0x1a8] sm:$0xff]  ;;  %v1462_v9 = vld [vmem:[%s3304_s4 + $0x120] sm:$0xff] }
 0x2c8   : > { %vm1312_vm7 = vcmp.lt.s32.totalorder %v1311_v12, %v1168_v58  ;;  %1260 = vmin.xlane.f32.xlu0 %v2885_v40  ;;  %v2891_v7 = vsel %vm1294_vm6, %v1293_v48, %v1165_v60  ;;  %v2117_v33 = vpack.c.bf16 %v1443_v36, %v1442_v0  ;;  %v2119_v37 = vpack.c.bf16 %v1427_v35, %v1426_v26  ;;  %v1478_v60 = vld [vmem:[%s3304_s4 + $0x1a0] sm:$0xff]  ;;  %v1433_v48 = vld [vmem:[%s3304_s4 + $0x38] sm:$0xff]  ;;  %v1464_v35 = vld [vmem:[%s3304_s4 + $0x130] sm:$0xff] }
 0x2c9   : > { %v1313_v22 = vsel %vm1312_vm7, %v1311_v12, %v1168_v58  ;;  %v2896_v27 = vcvt.s32.f32 %v1277_v50  ;;  %v1297_v24 = vshra.s32 %v2891_v7, 16  ;;  %v2121_v38 = vpack.c.bf16 %v1445_v54, %v1444_v31  ;;  %v1432_v58 = vld [vmem:[%s3304_s4 + $0x30] sm:$0xff]  ;;  %v1463_v50 = vld [vmem:[%s3304_s4 + $0x128] sm:$0xff]  ;;  %v1481_v0 = vld [vmem:[%s3304_s4 + $0x1b8] sm:$0xff] }
 0x2ca   : > { %vm1314_vm8 = vcmp.lt.s32.totalorder %v1313_v22, %v1169_v8  ;;  %2118 = vmatprep.subr.bf16.mxu0 %v2117_v33  ;;  %v2123_v43 = vpack.c.bf16 %v1429_v47, %v1428_v56  ;;  %v2945_v45 = vpack.c.bf16 %v1475_v42, %v1474_v25  ;;  %v2947_v62 = vpack.c.bf16 %v1459_v57, %v1458_v52  ;;  %v1434_v26 = vld [vmem:[%s3304_s4 + $0x40] sm:$0xff]  ;;  %v1465_v31 = vld [vmem:[%s3304_s4 + $0x138] sm:$0xff]  ;;  %v1483_v56 = vld [vmem:[%s3304_s4 + $0x1c8] sm:$0xff] }
 0x2cb   : > { %v2899_v28 = vsel %vm1314_vm8, %v1313_v22, %v1169_v8  ;;  %1280 = vmin.xlane.f32.xlu1 %v2896_v27  ;;  %v2902_v13 = vcvt.s32.f32 %v1297_v24  ;;  %2120 = vmatpush3.bf16.msra.mxu0 %v2119_v37  ;;  %v2125_v29 = vpack.c.bf16 %v1447_v46, %v1446_v53  ;;  %v2968_v1 = vpack.c.bf16 %v1477_v10, %v1476_v4  ;;  %v1450_v8 = vld [vmem:[%s3304_s4 + $0xc0] sm:$0xff]  ;;  %v1451_v22 = vld [vmem:[%s3304_s4 + $0xc8] sm:$0xff]  ;;  %v1480_v24 = vld [vmem:[%s3304_s4 + $0x1b0] sm:$0xff] }
 0x2cc   : > { %v1317_v30 = vshra.s32 %v2899_v28, 16  ;;  %2122 = vmatprep.subr.bf16.mxu0 %v2121_v38  ;;  %2181 = vmatprep.subr.bf16.mxu1 %v2945_v45  ;;  %v2980_v44 = vpack.c.bf16 %v1461_v14, %v1460_v16  ;;  %v2127_v18 = vpack.c.bf16 %v1431_v2, %v1430_v63  ;;  %v2129_v49 = vpack.c.bf16 %v1449_v17, %v1448_v19  ;;  %v1435_v37 = vld [vmem:[%s3304_s4 + $0x48] sm:$0xff]  ;;  %v1482_v38 = vld [vmem:[%s3304_s4 + $0x1c0] sm:$0xff]  ;;  %v1452_v47 = vld [vmem:[%s3304_s4 + $0xd0] sm:$0xff] }
 0x2cd   : > { %1300 = vmin.xlane.f32.xlu0 %v2902_v13  ;;  %2189 = vmatpush3.bf16.msra.mxu1 %v2947_v62  ;;  %v3001_v12 = vpack.c.bf16 %v1479_v61, %v1478_v60  ;;  %v2131_v36 = vpack.c.bf16 %v1433_v48, %v1432_v58  ;;  %v3025_v33 = vpack.c.bf16 %v1481_v0, %v1480_v24  ;;  %v1453_v25 = vld [vmem:[%s3304_s4 + $0xd8] sm:$0xff]  ;;  %v1436_v57 = vld [vmem:[%s3304_s4 + $0x50] sm:$0xff]  ;;  %v1466_v53 = vld [vmem:[%s3304_s4 + $0x140] sm:$0xff]  ;;  %v1196_v0 = vand.u32 65535, %v2824_v32 }
 0x2ce   : > { %v2906_v15 = vcvt.s32.f32 %v1317_v30  ;;  %2182 = vmatprep.subr.bf16.mxu1 %v2968_v1  ;;  %v3016_v30 = vpack.c.bf16 %v1463_v50, %v1462_v9  ;;  %v2133_v54 = vpack.c.bf16 %v1451_v22, %v1450_v8  ;;  %v3049_v42 = vpack.c.bf16 %v1465_v31, %v1464_v35  ;;  %v1467_v46 = vld [vmem:[%s3304_s4 + $0x148] sm:$0xff]  ;;  %v1484_v2 = vld [vmem:[%s3304_s4 + $0x1d0] sm:$0xff]  ;;  %v1485_v4 = vld [vmem:[%s3304_s4 + $0x1d8] sm:$0xff] }
 0x2cf   : > { %2124 = vmatpush3.bf16.msra.mxu0 %v2123_v43  ;;  %v2135_v52 = vpack.c.bf16 %v1435_v37, %v1434_v26  ;;  %v3055_v43 = vpack.c.bf16 %v1483_v56, %v1482_v38  ;;  %v2137_v63 = vpack.c.bf16 %v1453_v25, %v1452_v47  ;;  %v1454_v10 = vld [vmem:[%s3304_s4 + $0xe0] sm:$0xff]  ;;  %v1455_v16 = vld [vmem:[%s3304_s4 + $0xe8] sm:$0xff]  ;;  %v3079_v14 = vpack.c.bf16 %v1467_v46, %v1466_v53  ;;  %v1469_v60 = vld [vmem:[%s3304_s4 + $0x158] sm:$0xff] }
 0x2d0   : > { %1320 = vmin.xlane.f32.xlu1 %v2906_v15  ;;  %2126 = vmatprep.subr.bf16.mxu0 %v2125_v29  ;;  %v1437_v29 = vld [vmem:[%s3304_s4 + $0x58] sm:$0xff]  ;;  %v3082_v17 = vpack.c.bf16 %v1485_v4, %v1484_v2  ;;  %v2141_v61 = vpack.c.bf16 %v1455_v16, %v1454_v10  ;;  %v1438_v9 = vld [vmem:[%s3304_s4 + $0x60] sm:$0xff]  ;;  %v1176_v50 = vand.u32 65535, %v2807_v23  ;;  %v1198_v26 = vcvt.s32.f32 %v1196_v0  ;;  %v1456_v25 = vld [vmem:[%s3304_s4 + $0xf0] sm:$0xff] }
 0x2d1   : > { %2190 = vmatpush3.bf16.msra.mxu1 %v2980_v44  ;;  %v2139_v19 = vpack.c.bf16 %v1437_v29, %v1436_v57  ;;  %v1216_v35 = vand.u32 65535, %v2839_v11  ;;  %v1236_v37 = vand.u32 65535, %v2855_v20  ;;  %v1256_v11 = vand.u32 65535, %v2871_v34  ;;  %v1440_v34 = vld [vmem:[%s3304_s4 + $0x70] sm:$0xff]  ;;  %v1487_v57 = vld [vmem:[%s3304_s4 + $0x1e8] sm:$0xff]  ;;  %v1470_v4 = vld [vmem:[%s3304_s4 + $0x160] sm:$0xff] }
 0x2d2   : > { %2183 = vmatprep.subr.bf16.mxu1 %v3001_v12  ;;  %v1178_v22 = vcvt.s32.f32 %v1176_v50  ;;  %v1276_v56 = vand.u32 65535, %v2887_v55  ;;  %v1471_v10 = vld [vmem:[%s3304_s4 + $0x168] sm:$0xff] }
 0x2d3   : > { %2128 = vmatpush3.bf16.msra.mxu0 %v2127_v18  ;;  %v1468_v18 = vld [vmem:[%s3304_s4 + $0x150] sm:$0xff]  ;;  %v1238_v38 = vcvt.s32.f32 %v1236_v37  ;;  %v1258_v20 = vcvt.s32.f32 %v1256_v11  ;;  %v3159_v16 = vpack.c.bf16 %v1471_v10, %v1470_v4 }
 0x2d4   : > { %2130 = vmatprep.subr.bf16.mxu0 %v2129_v49  ;;  %v1439_v49 = vld [vmem:[%s3304_s4 + $0x68] sm:$0xff]  ;;  %v3097_v58 = vpack.c.bf16 %v1469_v60, %v1468_v18  ;;  %v1278_v46 = vcvt.s32.f32 %v1276_v56 }
 0x2d5   : > { %2191 = vmatpush3.bf16.msra.mxu1 %v3016_v30  ;;  %v2143_v48 = vpack.c.bf16 %v1439_v49, %v1438_v9  ;;  %v1488_v9 = vld [vmem:[%s3304_s4 + $0x1f0] sm:$0xff]  ;;  %v1489_v49 = vld [vmem:[%s3304_s4 + $0x1f8] sm:$0xff] }
 0x2d6   : > { %2184 = vmatprep.subr.bf16.mxu1 %v3025_v33 }
 0x2d7   : > { %2132 = vmatpush3.bf16.msra.mxu0 %v2131_v36 }
 0x2d8   : > { %2134 = vmatprep.subr.bf16.mxu0 %v2133_v54  ;;  %v1218_v54 = vcvt.s32.f32 %v1216_v35 }
 0x2d9   : > { %2192 = vmatpush3.bf16.msra.mxu1 %v3049_v42 }
 0x2da   : > { %2185 = vmatprep.subr.bf16.mxu1 %v3055_v43 }
 0x2db   : > { %2136 = vmatpush3.bf16.msra.mxu0 %v2135_v52 }
 0x2dc   : > { %2138 = vmatprep.subr.bf16.mxu0 %v2137_v63  ;;  %v1316_v63 = vand.u32 65535, %v2899_v28 }
 0x2dd   : > { %2193 = vmatpush3.bf16.msra.mxu1 %v3079_v14 }
 0x2de   : > { %2186 = vmatprep.subr.bf16.mxu1 %v3082_v17 }
 0x2df   : > { %2140 = vmatpush3.bf16.msra.mxu0 %v2139_v19 }
 0x2e0   : > { %2142 = vmatprep.subr.bf16.mxu0 %v2141_v61 }
 0x2e1   : > { %2194 = vmatpush3.bf16.msra.mxu1 %v3097_v58 }
 0x2e3   : > { %2144 = vmatpush3.bf16.msra.mxu0 %v2143_v48  ;;  %v3181_v48 = vpack.c.bf16 %v1489_v49, %v1488_v9 }
 0x341   : > { %v3102_v8 = vpop.xlane.xlu0 %1180 }
 0x342   : > { %vm1182_vm9 = vcmp.eq.f32.partialorder %v2819_v39, %v3102_v8 }
 0x343   : > { %v1183_v24 = vsel %vm1182_vm9, %v1178_v22, inf }
 0x344   : > { %1184 = vmin.xlane.f32.xlu0 %v1183_v24  ;;  %v1187_v24 = vcvt.f32.s32 %v3102_v8 }
 0x349   : > { %v3107_v36 = vpop.xlane.xlu1 %1200 }
 0x34a   : > { %vm1202_vm10 = vcmp.eq.f32.partialorder %v2837_v51, %v3107_v36 }
 0x34b   : > { %v1203_v31 = vsel %vm1202_vm10, %v1198_v26, inf  ;;  %v1188_v26 = vshll.u32 %v1187_v24, 16 }
 0x34c   : > { %1204 = vmin.xlane.f32.xlu1 %v1203_v31 }
 0x34d   : > { %v3112_v23 = vpop.xlane.xlu0 %1220 }
 0x34e   : > { %vm1222_vm11 = vcmp.eq.f32.partialorder %v2853_v3, %v3112_v23  ;;  %v1296_v3 = vand.u32 65535, %v2891_v7  ;;  %v1486_v7 = vld [vmem:[%s3304_s4 + $0x1e0] sm:$0xff] }
 0x34f   : > { %v1223_v39 = vsel %vm1222_vm11, %v1218_v54, inf  ;;  %v3149_v2 = vpack.c.bf16 %v1487_v57, %v1486_v7  ;;  %v1227_v54 = vcvt.f32.s32 %v3112_v23 }
 0x350   : > { %1224 = vmin.xlane.f32.xlu0 %v1223_v39  ;;  %v1298_v28 = vcvt.s32.f32 %v1296_v3  ;;  %v2245_v39 = vmov 1.0  }
 0x351   : > { %v3117_v32 = vpop.xlane.xlu1 %1240  ;;  %2187 = vmatprep.subr.bf16.mxu1 %v3149_v2  ;;  %v1228_v11 = vshll.u32 %v1227_v54, 16 }
 0x352   : > { %vm1242_vm12 = vcmp.eq.f32.partialorder %v2869_v21, %v3117_v32  ;;  %v1457_v21 = vld [vmem:[%s3304_s4 + $0xf8] sm:$0xff]  ;;  %2195 = vmatpush3.bf16.msra.mxu1 %v3159_v16 }
 0x353   : > { %v1243_v51 = vsel %vm1242_vm12, %v1238_v38, inf  ;;  %v2145_v52 = vpack.c.bf16 %v1457_v21, %v1456_v25  ;;  %2188 = vmatprep.subr.bf16.mxu1 %v3181_v48 }
 0x354   : > { %1244 = vmin.xlane.f32.xlu1 %v1243_v51  ;;  %v1247_v51 = vcvt.f32.s32 %v3117_v32 }
 0x355   : > { %v3123_v47 = vpop.xlane.xlu0 %1260  ;;  %2146 = vmatprep.subr.bf16.mxu0 %v2145_v52 }
 0x356   : > { %vm1262_vm13 = vcmp.eq.f32.partialorder %v2885_v40, %v3123_v47  ;;  %v1441_v40 = vld [vmem:[%s3304_s4 + $0x78] sm:$0xff]  ;;  %v1267_v23 = vcvt.f32.s32 %v3123_v47 }
 0x357   : > { %v1263_v55 = vsel %vm1262_vm13, %v1258_v20, inf  ;;  %v2147_v29 = vpack.c.bf16 %v1441_v40, %v1440_v34 }
 0x358   : > { %1264 = vmin.xlane.f32.xlu0 %v1263_v55  ;;  %v3146_v53 = vpop.xlane.xlu1 %1280 }
 0x359   : > { %vm1282_vm14 = vcmp.eq.f32.partialorder %v2896_v27, %v3146_v53  ;;  %2148 = vmatpush3.bf16.msra.mxu0 %v2147_v29  ;;  %v1318_v27 = vcvt.s32.f32 %v1316_v63  ;;  %v1287_v47 = vcvt.f32.s32 %v3146_v53 }
 0x35a   : > { %v1283_v19 = vsel %vm1282_vm14, %v1278_v46, inf  ;;  %v3161_v18 = vpop.xlane.xlu0 %1300  ;;  %2150 = vmatprep.subr.bf16.mxu0 %v2945_v45  ;;  %v1473_v45 = vld [vmem:[%s3304_s4 + $0x178] sm:$0xff] }
 0x35b   : > { %1284 = vmin.xlane.f32.xlu1 %v1283_v19  ;;  %vm1302_vm15 = vcmp.eq.f32.partialorder %v2902_v13, %v3161_v18  ;;  %v1472_v13 = vld [vmem:[%s3304_s4 + $0x170] sm:$0xff]  ;;  %v1307_v34 = vcvt.f32.s32 %v3161_v18  ;;  %v1288_v52 = vshll.u32 %v1287_v47, 16 }
 0x35c   : > { %v1303_v60 = vsel %vm1302_vm15, %v1298_v28, inf  ;;  %v3186_v22 = vpack.c.bf16 %v1473_v45, %v1472_v13 }
 0x35d   : > { %v3167_v61 = vpop.xlane.xlu1 %1320  ;;  %1304 = vmin.xlane.f32.xlu0 %v1303_v60  ;;  %v1308_v57 = vshll.u32 %v1307_v34, 16 }
 0x35e   : > { %vm1322_vm0 = vcmp.eq.f32.partialorder %v2906_v15, %v3167_v61  ;;  %2196 = vmatpush3.bf16.msra.mxu1 %v3186_v22  ;;  %v1207_v15 = vcvt.f32.s32 %v3107_v36 }
 0x35f   : > { %v1323_v50 = vsel %vm1322_vm0, %v1318_v27, inf }
 0x360   : > { %1324 = vmin.xlane.f32.xlu1 %v1323_v50  ;;  %v1208_v8 = vshll.u32 %v1207_v15, 16 }
 0x3d1   : > { %v1185_v0 = vpop.xlane.xlu0 %1184 }
 0x3d2   : > { %v1186_v35 = vcvt.f32.s32 %v1185_v0 }
 0x3d4   : > { %v3192_v31 = vadd.s32 %v1188_v26, %v1186_v35 }
 0x3d6   : > { %vm1331_vm1 = vcmp.eq.s32.totalorder %v2779_v6, %v3192_v31  ;;  %vm1330_vm2 = vcmp.eq.s32.totalorder %v2776_v5, %v3192_v31 }
 0x3d7   : > { %1846 = vmatprep.mubr.msk.f32.mxu0 %vm1331_vm1, %v2245_v39 }
 0x3d8   : > { %1847 = vmatmul.mubr.msk.f32.vlgmr.msra.gmra.mrb[8].mxu0 %vm1330_vm2, %v2245_v39 }
 0x3d9   : > { %v1205_v37 = vpop.xlane.xlu1 %1204  ;;  %2152 = vmatpush3.bf16.msra.mxu0 %v2947_v62 }
 0x3da   : > { %v1206_v38 = vcvt.f32.s32 %v1205_v37  ;;  %2154 = vmatprep.subr.bf16.mxu0 %v2968_v1  ;;  %v1248_v1 = vshll.u32 %v1247_v51, 16 }
 0x3dc   : > { %v1209_v36 = vadd.s32 %v1208_v8, %v1206_v38 }
 0x3dd   : > { %v1225_v56 = vpop.xlane.xlu0 %1224  ;;  %2156 = vmatpush3.bf16.msra.mxu0 %v2980_v44  ;;  %v1268_v44 = vshll.u32 %v1267_v23, 16 }
 0x3de   : > { %v1226_v20 = vcvt.f32.s32 %v1225_v56  ;;  %vm1335_vm3 = vcmp.eq.s32.totalorder %v2779_v6, %v1209_v36  ;;  %vm1337_vm4 = vcmp.eq.s32.totalorder %v2790_v41, %v1209_v36  ;;  %vm1334_vm5 = vcmp.eq.s32.totalorder %v2776_v5, %v1209_v36  ;;  %2158 = vmatprep.subr.bf16.mxu0 %v3001_v12 }
 0x3df   : > { %1848 = vmatprep.mubr.msk.f32.mxu0 %vm1335_vm3, %v2245_v39  ;;  %1864 = vmatprep.mubr.msk.f32.mxu1 %vm1337_vm4, %v2245_v39  ;;  %vm1336_vm6 = vcmp.eq.s32.totalorder %v2782_v59, %v1209_v36 }
 0x3e0   : > { %v1229_v62 = vadd.s32 %v1228_v11, %v1226_v20  ;;  %1849 = vmatmul.mubr.msk.f32.gmra.mrb[10].mxu0 %vm1334_vm5, %v2245_v39  ;;  %1865 = vmatmul.mubr.msk.f32.vlgmr.msra.gmra.mrb[32].mxu1 %vm1336_vm6, %v2245_v39 }
 0x3e1   : > { %v1245_v32 = vpop.xlane.xlu1 %1244  ;;  %2160 = vmatpush3.bf16.msra.mxu0 %v3016_v30 }
 0x3e2   : > { %v1246_v3 = vcvt.f32.s32 %v1245_v32  ;;  %vm1339_vm7 = vcmp.eq.s32.totalorder %v2779_v6, %v1229_v62  ;;  %vm1341_vm8 = vcmp.eq.s32.totalorder %v2790_v41, %v1229_v62  ;;  %vm1338_vm9 = vcmp.eq.s32.totalorder %v2776_v5, %v1229_v62  ;;  %2162 = vmatprep.subr.bf16.mxu0 %v3025_v33 }
 0x3e3   : > { %1850 = vmatprep.mubr.msk.f32.mxu0 %vm1339_vm7, %v2245_v39  ;;  %1866 = vmatprep.mubr.msk.f32.mxu1 %vm1341_vm8, %v2245_v39  ;;  %vm1340_vm10 = vcmp.eq.s32.totalorder %v2782_v59, %v1229_v62  ;;  %v1327_v33 = vcvt.f32.s32 %v3167_v61 }
 0x3e4   : > { %v1249_v25 = vadd.s32 %v1248_v1, %v1246_v3  ;;  %1851 = vmatmul.mubr.msk.f32.gmra.mrb[12].mxu0 %vm1338_vm9, %v2245_v39  ;;  %1867 = vmatmul.mubr.msk.f32.gmra.mrb[34].mxu1 %vm1340_vm10, %v2245_v39 }
 0x3e5   : > { %v1265_v12 = vpop.xlane.xlu0 %1264  ;;  %2164 = vmatpush3.bf16.msra.mxu0 %v3049_v42  ;;  %v1328_v63 = vshll.u32 %v1327_v33, 16 }
 0x3e6   : > { %v1266_v21 = vcvt.f32.s32 %v1265_v12  ;;  %vm1343_vm11 = vcmp.eq.s32.totalorder %v2779_v6, %v1249_v25  ;;  %vm1345_vm12 = vcmp.eq.s32.totalorder %v2790_v41, %v1249_v25  ;;  %vm1342_vm13 = vcmp.eq.s32.totalorder %v2776_v5, %v1249_v25  ;;  %2166 = vmatprep.subr.bf16.mxu0 %v3055_v43 }
 0x3e7   : > { %1852 = vmatprep.mubr.msk.f32.mxu0 %vm1343_vm11, %v2245_v39  ;;  %1868 = vmatprep.mubr.msk.f32.mxu1 %vm1345_vm12, %v2245_v39  ;;  %vm1344_vm14 = vcmp.eq.s32.totalorder %v2782_v59, %v1249_v25 }
 0x3e8   : > { %v1269_v55 = vadd.s32 %v1268_v44, %v1266_v21  ;;  %1853 = vmatmul.mubr.msk.f32.gmra.mrb[14].mxu0 %vm1342_vm13, %v2245_v39  ;;  %1869 = vmatmul.mubr.msk.f32.gmra.mrb[36].mxu1 %vm1344_vm14, %v2245_v39  ;;  %v1285_v30 = vpop.xlane.xlu1 %1284 }
 0x3e9   : > { %v1286_v40 = vcvt.f32.s32 %v1285_v30  ;;  %2168 = vmatpush3.bf16.msra.mxu0 %v3079_v14 }
 0x3ea   : > { %vm1347_vm15 = vcmp.eq.s32.totalorder %v2779_v6, %v1269_v55  ;;  %vm1349_vm0 = vcmp.eq.s32.totalorder %v2790_v41, %v1269_v55  ;;  %vm1346_vm1 = vcmp.eq.s32.totalorder %v2776_v5, %v1269_v55  ;;  %vm1348_vm2 = vcmp.eq.s32.totalorder %v2782_v59, %v1269_v55  ;;  %v1305_v7 = vpop.xlane.xlu0 %1304  ;;  %2170 = vmatprep.subr.bf16.mxu0 %v3082_v17 }
 0x3eb   : > { %v1289_v53 = vadd.s32 %v1288_v52, %v1286_v40  ;;  %1854 = vmatprep.mubr.msk.f32.mxu0 %vm1347_vm15, %v2245_v39  ;;  %1870 = vmatprep.mubr.msk.f32.mxu1 %vm1349_vm0, %v2245_v39  ;;  %v1306_v46 = vcvt.f32.s32 %v1305_v7  ;;  %vm1333_vm15 = vcmp.eq.s32.totalorder %v2790_v41, %v3192_v31  ;;  %vm1332_vm0 = vcmp.eq.s32.totalorder %v2782_v59, %v3192_v31 }
 0x3ec   : > { %1855 = vmatmul.mubr.msk.f32.gmra.mrb[16].mxu0 %vm1346_vm1, %v2245_v39  ;;  %1871 = vmatmul.mubr.msk.f32.gmra.mrb[38].mxu1 %vm1348_vm2, %v2245_v39 }
 0x3ed   : > { %v1325_v42 = vpop.xlane.xlu1 %1324  ;;  %v1309_v43 = vadd.s32 %v1308_v57, %v1306_v46  ;;  %vm1351_vm3 = vcmp.eq.s32.totalorder %v2779_v6, %v1289_v53  ;;  %vm1353_vm4 = vcmp.eq.s32.totalorder %v2790_v41, %v1289_v53  ;;  %vm1350_vm5 = vcmp.eq.s32.totalorder %v2776_v5, %v1289_v53  ;;  %2172 = vmatpush3.bf16.msra.mxu0 %v3097_v58 }
 0x3ee   : > { %1856 = vmatprep.mubr.msk.f32.mxu0 %vm1351_vm3, %v2245_v39  ;;  %vm1352_vm6 = vcmp.eq.s32.totalorder %v2782_v59, %v1289_v53  ;;  %v1326_v29 = vcvt.f32.s32 %v1325_v42  ;;  %1872 = vmatprep.mubr.msk.f32.mxu1 %vm1353_vm4, %v2245_v39 }
 0x3ef   : > { %vm1355_vm7 = vcmp.eq.s32.totalorder %v2779_v6, %v1309_v43  ;;  %vm1357_vm8 = vcmp.eq.s32.totalorder %v2790_v41, %v1309_v43  ;;  %vm1354_vm9 = vcmp.eq.s32.totalorder %v2776_v5, %v1309_v43  ;;  %vm1356_vm10 = vcmp.eq.s32.totalorder %v2782_v59, %v1309_v43  ;;  %2174 = vmatprep.subr.bf16.mxu0 %v3149_v2 }
 0x3f0   : > { %1857 = vmatmul.mubr.msk.f32.gmra.mrb[18].mxu0 %vm1350_vm5, %v2245_v39  ;;  %1873 = vmatmul.mubr.msk.f32.gmra.mrb[40].mxu1 %vm1352_vm6, %v2245_v39  ;;  %v1329_v14 = vadd.s32 %v1328_v63, %v1326_v29 }
 0x3f1   : > { %1858 = vmatprep.mubr.msk.f32.mxu0 %vm1355_vm7, %v2245_v39  ;;  %1874 = vmatprep.mubr.msk.f32.mxu1 %vm1357_vm8, %v2245_v39 }
 0x3f2   : > { %vm1359_vm11 = vcmp.eq.s32.totalorder %v2779_v6, %v1329_v14  ;;  %vm1361_vm12 = vcmp.eq.s32.totalorder %v2790_v41, %v1329_v14  ;;  %2176 = vmatpush3.bf16.msra.mxu0 %v3159_v16  ;;  %vm1358_vm13 = vcmp.eq.s32.totalorder %v2776_v5, %v1329_v14  ;;  %vm1360_vm14 = vcmp.eq.s32.totalorder %v2782_v59, %v1329_v14 }
 0x3f3   : > { %2178 = vmatprep.subr.bf16.mxu0 %v3181_v48 }
 0x3f4   : > { %1859 = vmatmul.mubr.msk.f32.gmra.mrb[20].mxu0 %vm1354_vm9, %v2245_v39  ;;  %1875 = vmatmul.mubr.msk.f32.gmra.mrb[42].mxu1 %vm1356_vm10, %v2245_v39 }
 0x3f5   : > { %1860 = vmatprep.mubr.msk.f32.mxu0 %vm1359_vm11, %v2245_v39  ;;  %1876 = vmatprep.mubr.msk.f32.mxu1 %vm1361_vm12, %v2245_v39 }
 0x3f6   : > { %2180 = vmatpush3.bf16.msra.mxu0 %v3186_v22 }
 0x3f8   : > { %1861 = vmatmul.mubr.msk.f32.gmra.mrb[22].mxu0 %vm1358_vm13, %v2245_v39  ;;  %1877 = vmatmul.mubr.msk.f32.gmra.mrb[44].mxu1 %vm1360_vm14, %v2245_v39 }
 0x3f9   : > { %1862 = vmatprep.mubr.msk.f32.mxu0 %vm1333_vm15, %v2245_v39 }
 0x3fc   : > { %1863 = vmatmul.mubr.msk.f32.vlgmr.msra.gmra.mrb[24].mxu0 %vm1332_vm0, %v2245_v39 }
 0x4ab   : > { %v1933_v5 = vpop.f32.mrb[8].mxu0 }
 0x4ac   : > { %v1934_v6 = vpop.f32.mrb[9].mxu0 }
 0x4ad   : > { %v1935_v17 = vadd.f32 %v1934_v6, %v1933_v5 }
 0x4b3   : > { %v1936_v58 = vpop.f32.mrb[10].mxu0  ;;  %v1992_v2 = vpop.f32.mrb[32].mxu1 }
 0x4b4   : > { %v1937_v4 = vpop.f32.mrb[11].mxu0  ;;  %v1993_v10 = vpop.f32.mrb[33].mxu1 }
 0x4b5   : > { %v1938_v16 = vadd.f32 %v1937_v4, %v1936_v58  ;;  %v1994_v19 = vadd.f32 %v1993_v10, %v1992_v2 }
 0x4b7   : > { %v1667_v59 = vadd.f32 %v1994_v19, %v1938_v16  ;;  %v1939_v41 = vpop.f32.mrb[12].mxu0  ;;  %v1995_v18 = vpop.f32.mrb[34].mxu1 }
 0x4b8   : > { %v1940_v28 = vpop.f32.mrb[13].mxu0  ;;  %v1996_v60 = vpop.f32.mrb[35].mxu1 }
 0x4b9   : > { %1701 = vst [vmem:[%s3287_s11 + $0x8] sm:$0xff] %v1667_v59  ;;  %v1941_v61 = vadd.f32 %v1940_v28, %v1939_v41  ;;  %v1997_v27 = vadd.f32 %v1996_v60, %v1995_v18 }
 0x4bb   : > { %v1672_v9 = vadd.f32 %v1997_v27, %v1941_v61  ;;  %v1942_v49 = vpop.f32.mrb[14].mxu0  ;;  %v1998_v13 = vpop.f32.mrb[36].mxu1 }
 0x4bc   : > { %v1943_v48 = vpop.f32.mrb[15].mxu0  ;;  %v1999_v45 = vpop.f32.mrb[37].mxu1 }
 0x4bd   : > { %1702 = vst [vmem:[%s3287_s11 + $0x10] sm:$0xff] %v1672_v9  ;;  %v1944_v50 = vadd.f32 %v1943_v48, %v1942_v49  ;;  %v2000_v22 = vadd.f32 %v1999_v45, %v1998_v13 }
 0x4bf   : > { %v1677_v24 = vadd.f32 %v2000_v22, %v1944_v50  ;;  %v1945_v0 = vpop.f32.mrb[16].mxu0  ;;  %v2001_v26 = vpop.f32.mrb[38].mxu1 }
 0x4c0   : > { %v1946_v35 = vpop.f32.mrb[17].mxu0  ;;  %v2002_v15 = vpop.f32.mrb[39].mxu1 }
 0x4c1   : > { %1703 = vst [vmem:[%s3287_s11 + $0x18] sm:$0xff] %v1677_v24  ;;  %v1947_v31 = vadd.f32 %v1946_v35, %v1945_v0  ;;  %v2003_v54 = vadd.f32 %v2002_v15, %v2001_v26 }
 0x4c3   : > { %v1682_v37 = vadd.f32 %v2003_v54, %v1947_v31  ;;  %v1948_v39 = vpop.f32.mrb[18].mxu0  ;;  %v2004_v8 = vpop.f32.mrb[40].mxu1 }
 0x4c4   : > { %v1949_v38 = vpop.f32.mrb[19].mxu0  ;;  %v2005_v36 = vpop.f32.mrb[41].mxu1 }
 0x4c5   : > { %1704 = vst [vmem:[%s3287_s11 + $0x20] sm:$0xff] %v1682_v37  ;;  %v1950_v11 = vadd.f32 %v1949_v38, %v1948_v39  ;;  %v2006_v51 = vadd.f32 %v2005_v36, %v2004_v8 }
 0x4c7   : > { %v1687_v56 = vadd.f32 %v2006_v51, %v1950_v11  ;;  %v1951_v20 = vpop.f32.mrb[20].mxu0  ;;  %v2007_v62 = vpop.f32.mrb[42].mxu1 }
 0x4c8   : > { %v1952_v1 = vpop.f32.mrb[21].mxu0  ;;  %v2008_v23 = vpop.f32.mrb[43].mxu1 }
 0x4c9   : > { %1705 = vst [vmem:[%s3287_s11 + $0x28] sm:$0xff] %v1687_v56  ;;  %v1953_v32 = vadd.f32 %v1952_v1, %v1951_v20  ;;  %v2009_v3 = vadd.f32 %v2008_v23, %v2007_v62 }
 0x4cb   : > { %v1692_v25 = vadd.f32 %v2009_v3, %v1953_v32  ;;  %v1954_v44 = vpop.f32.mrb[22].mxu0  ;;  %v2010_v47 = vpop.f32.mrb[44].mxu1 }
 0x4cc   : > { %v1955_v12 = vpop.f32.mrb[23].mxu0  ;;  %v2011_v21 = vpop.f32.mrb[45].mxu1 }
 0x4cd   : > { %1706 = vst [vmem:[%s3287_s11 + $0x30] sm:$0xff] %v1692_v25  ;;  %v1956_v34 = vadd.f32 %v1955_v12, %v1954_v44  ;;  %v2012_v55 = vadd.f32 %v2011_v21, %v2010_v47 }
 0x4cf   : > { %v1697_v30 = vadd.f32 %v2012_v55, %v1956_v34  ;;  %v1989_v52 = vpop.f32.mrb[24].mxu0 }
 0x4d0   : > { %v1990_v33 = vpop.f32.mrb[25].mxu0 }
 0x4d1   : > { %1707 = vst [vmem:[%s3287_s11 + $0x38] sm:$0xff] %v1697_v30  ;;  %v1991_v40 = vadd.f32 %v1990_v33, %v1989_v52 }
 0x4d3   : > { %v1662_v7 = vadd.f32 %v1991_v40, %v1935_v17 }
 0x4d5   : > { %1700 = vst [vmem:[%s3287_s11] sm:$0xff] %v1662_v7 }
 0x4d6 PF: > { %s16_s21 = sadd.s32 1, %s2242_s21  }
 0x4d7   : > { %p13_p4 = scmp.ge.s32.totalorder %s16_s21, 4  }
 0x4d9   :  { %15 = sbr.rel (!%p13_p4) target bundleno = 1 (0x1), region = 78 }

// kernel: autoencoder_forward.3
= control target key start
LH: loop header
LB: loop body
LE: loop exit
PB: predicated region body
PF: predicated region fallthrough
CT: control target
= control target key end

     0   :  { %s2358_s12 = smov 0   ;;  %s2726_s0 = inlined_call_operand.vmem [shape: f32[2,10,10,128], index: 0, kind: input, shape index: {}]   ;;  %s2727_s1 = inlined_call_operand.vmem [shape: bf16[9,128,128], index: 1, kind: input, shape index: {}]   ;;  %s2728_s2 = inlined_call_operand.vmem [shape: f32[1,128], index: 2, kind: input, shape index: {}]   ;;  %s2729_s3 = inlined_call_operand.vmem [shape: f32[2,8,8,128], index: 3, kind: output, shape index: {}]  }
   0x1 LB: > { %s1585_s13 = sadd.s32 4294967295, %s2336_s12   ;;  %p1589_p0 = scmp.ge.s32.totalorder %s2336_s12, 1  ;;  %s2336_s12 = sphi %s2358_s12, %s13_s12  }
   0x2   : > { %p137_p1 = scmp.lt.s32.totalorder %s2336_s12, 3 }
   0x4   : > { %p138_p2 = pnand %p1589_p0, %p137_p1 }
   0x5   : > { %v2258_v0 = vld [vmem:[%s2727_s1 + $0x40] sm:$0xff] (!%p138_p2)   ;;  %p161_p3 = scmp.lt.s32.totalorder (!%p138_p2), %s1585_s13, 1  ;;  %v2260_v2 = vld [vmem:[%s2727_s1 + $0x48] sm:$0xff] (!%p138_p2)   ;;  %v2262_v4 = vld [vmem:[%s2727_s1 + $0x50] sm:$0xff] (!%p138_p2)  }
   0x6   : > { %141 = sbr.rel (%p138_p2) target bundleno = 387 (0x183), region = 32  ;;  %v2259_v1 = vld [vmem:[%s2727_s1 + $0x100] sm:$0xff] (!%p138_p2)   ;;  %1953 = vmatprep.subr.bf16.mxu1 (!%p138_p2), %v2258_v0  ;;  %v2261_v3 = vld [vmem:[%s2727_s1 + $0x108] sm:$0xff] (!%p138_p2)   ;;  %v2263_v5 = vld [vmem:[%s2727_s1 + $0x110] sm:$0xff] (!%p138_p2)  }
   0x7   : > { %2049 = vmatprep.subr.bf16.mxu0 (!%p138_p2), %v2259_v1  ;;  %1954 = vmatpush3.bf16.msra.mxu1 (!%p138_p2), %v2258_v0  ;;  %v2264_v6 = vld [vmem:[%s2727_s1 + $0x58] sm:$0xff] (!%p138_p2)   ;;  %v2266_v8 = vld [vmem:[%s2727_s1 + $0x60] sm:$0xff] (!%p138_p2)   ;;  %v2268_v10 = vld [vmem:[%s2727_s1 + $0x68] sm:$0xff] (!%p138_p2)  }
   0x8   : > { %2050 = vmatpush3.bf16.msra.mxu0 (!%p138_p2), %v2259_v1  ;;  %1955 = vmatprep.subr.bf16.mxu1 (!%p138_p2), %v2260_v2  ;;  %v2265_v7 = vld [vmem:[%s2727_s1 + $0x118] sm:$0xff] (!%p138_p2)   ;;  %v2267_v9 = vld [vmem:[%s2727_s1 + $0x120] sm:$0xff] (!%p138_p2)   ;;  %v2269_v13 = vld [vmem:[%s2727_s1 + $0x128] sm:$0xff] (!%p138_p2)  }
   0x9   : > { %2051 = vmatprep.subr.bf16.mxu0 (!%p138_p2), %v2261_v3  ;;  %v2270_v17 = vld [vmem:[%s2727_s1 + $0x70] sm:$0xff] (!%p138_p2)   ;;  %v2272_v19 = vld [vmem:[%s2727_s1 + $0x78] sm:$0xff] (!%p138_p2)   ;;  %v2274_v21 = vld [vmem:[%s2727_s1] sm:$0xff] (!%p138_p2)  }
   0xa   : > { %v2271_v18 = vld [vmem:[%s2727_s1 + $0x130] sm:$0xff] (!%p138_p2)   ;;  %v2273_v20 = vld [vmem:[%s2727_s1 + $0x138] sm:$0xff] (!%p138_p2)   ;;  %v2275_v24 = vld [vmem:[%s2727_s1 + $0x140] sm:$0xff] (!%p138_p2)  }
   0xb   : > { %1956 = vmatpush3.bf16.msra.mxu1 (!%p138_p2), %v2260_v2  ;;  %v2276_v29 = vld [vmem:[%s2727_s1 + $0x8] sm:$0xff] (!%p138_p2)   ;;  %v2278_v34 = vld [vmem:[%s2727_s1 + $0x10] sm:$0xff] (!%p138_p2)   ;;  %v2280_v43 = vld [vmem:[%s2727_s1 + $0x18] sm:$0xff] (!%p138_p2)  }
   0xc   : > { %2052 = vmatpush3.bf16.msra.mxu0 (!%p138_p2), %v2261_v3  ;;  %1957 = vmatprep.subr.bf16.mxu1 (!%p138_p2), %v2262_v4  ;;  %v2277_v30 = vld [vmem:[%s2727_s1 + $0x148] sm:$0xff] (!%p138_p2)   ;;  %v2279_v36 = vld [vmem:[%s2727_s1 + $0x150] sm:$0xff] (!%p138_p2)   ;;  %v2281_v44 = vld [vmem:[%s2727_s1 + $0x158] sm:$0xff] (!%p138_p2)  }
   0xd   : > { %s2731_s13 = smov (!%p161_p3, %s1585_s13), 1  ;;  %2053 = vmatprep.subr.bf16.mxu0 %v2263_v5  ;;  %v2282_v47 = vld [vmem:[%s2727_s1 + $0x20] sm:$0xff]   ;;  %v2284_v49 = vld [vmem:[%s2727_s1 + $0x28] sm:$0xff]   ;;  %v2286_v51 = vld [vmem:[%s2727_s1 + $0x30] sm:$0xff]  }
   0xe   : > { %s2249_s30 = smul.u32 160, %s2731_s13  ;;  %v2283_v48 = vld [vmem:[%s2727_s1 + $0x160] sm:$0xff]   ;;  %v2285_v50 = vld [vmem:[%s2727_s1 + $0x168] sm:$0xff]   ;;  %v2287_v52 = vld [vmem:[%s2727_s1 + $0x170] sm:$0xff]  }
   0xf   : > { %1958 = vmatpush3.bf16.msra.mxu1 %v2262_v4  ;;  %v2288_v53 = vld [vmem:[%s2727_s1 + $0x38] sm:$0xff]   ;;  %v2290_v57 = vld [vmem:[%s2727_s1 + $0x80] sm:$0xff]   ;;  %v2292_v0 = vld [vmem:[%s2727_s1 + $0x88] sm:$0xff]  }
  0x10   : > { %2054 = vmatpush3.bf16.msra.mxu0 %v2263_v5  ;;  %1959 = vmatprep.subr.bf16.mxu1 %v2264_v6  ;;  %s2402_s10 = scalar_lea.vmem %s2726_s0, %s2249_s30  ;;  %v2289_v54 = vld [vmem:[%s2727_s1 + $0x178] sm:$0xff]   ;;  %v2291_v59 = vld [vmem:[%s2727_s1 + $0x180] sm:$0xff]   ;;  %v2293_v4 = vld [vmem:[%s2727_s1 + $0x188] sm:$0xff]  }
  0x11   : > { %2055 = vmatprep.subr.bf16.mxu0 %v2265_v7  ;;  %v200_v11 = vld [vmem:[%s2402_s10 + $0x1] sm:$0xff]  ;;  %v201_v12 = vld [vmem:[%s2402_s10 + $0x11] sm:$0xff] }
  0x12   : > { %v208_v14 = vpack.c.bf16 %v201_v12, %v200_v11  ;;  %v1682_v15 = vld [vmem:[%s2402_s10 + $0x21] sm:$0xff]  ;;  %v203_v22 = vld [vmem:[%s2402_s10 + $0x31] sm:$0xff] }
  0x13   : > { %1960 = vmatpush3.bf16.msra.mxu1 %v2264_v6  ;;  %v764_v16 = vpack.c.bf16 %v1682_v15, %v201_v12  ;;  %v1684_v23 = vld [vmem:[%s2402_s10 + $0x41] sm:$0xff]  ;;  %v2433_v25 = vpack.c.bf16 %v203_v22, %v1682_v15  ;;  %v205_v26 = vld [vmem:[%s2402_s10 + $0x51] sm:$0xff] }
  0x14   : > { %2056 = vmatpush3.bf16.msra.mxu0 %v2265_v7  ;;  %1961 = vmatprep.subr.bf16.mxu1 %v2266_v8  ;;  %v765_v27 = vpack.c.bf16 %v1684_v23, %v203_v22  ;;  %v1686_v28 = vld [vmem:[%s2402_s10 + $0x61] sm:$0xff]  ;;  %v2443_v31 = vpack.c.bf16 %v205_v26, %v1684_v23  ;;  %v207_v33 = vld [vmem:[%s2402_s10 + $0x71] sm:$0xff] }
  0x15   : > { %2057 = vmatprep.subr.bf16.mxu0 %v2267_v9  ;;  %1969 = vmatprep.mubr.bf16.mxu1 %v208_v14  ;;  %v766_v32 = vpack.c.bf16 %v1686_v28, %v205_v26  ;;  %v2451_v35 = vld [vmem:[%s2402_s10 + $0x81] sm:$0xff]  ;;  %v2457_v37 = vpack.c.bf16 %v207_v33, %v1686_v28  ;;  %v2461_v39 = vld [vmem:[%s2402_s10 + $0x10] sm:$0xff]  ;;  %v2304_v26 = vld [vmem:[%s2727_s1 + $0xb8] sm:$0xff]  }
  0x16   : > { %2065 = vmatprep.mubr.bf16.mxu0 %v764_v16  ;;  %v172_v38 = vld [vmem:[%s2402_s10] sm:$0xff]  ;;  %v767_v40 = vpack.c.bf16 %v2451_v35, %v207_v33  ;;  %v2465_v41 = vld [vmem:[%s2402_s10 + $0x12] sm:$0xff]  ;;  %v2301_v22 = vld [vmem:[%s2727_s1 + $0x1a8] sm:$0xff]  }
  0x17   : > { %1962 = vmatpush3.bf16.msra.mxu1 %v2266_v8  ;;  %v2468_v42 = vld [vmem:[%s2402_s10 + $0x22] sm:$0xff]  ;;  %v180_v45 = vpack.c.bf16 %v2461_v39, %v172_v38  ;;  %v2508_v56 = vld [vmem:[%s2402_s10 + $0x30] sm:$0xff]  ;;  %v2296_v16 = vld [vmem:[%s2727_s1 + $0x98] sm:$0xff]  }
  0x18   : > { %2058 = vmatpush3.bf16.msra.mxu0 %v2267_v9  ;;  %1963 = vmatprep.subr.bf16.mxu1 %v2268_v10  ;;  %v914_v46 = vpack.c.bf16 %v2468_v42, %v2465_v41  ;;  %v2505_v55 = vld [vmem:[%s2402_s10 + $0x20] sm:$0xff]  ;;  %v2514_v58 = vld [vmem:[%s2402_s10 + $0x32] sm:$0xff]  ;;  %v2309_v33 = vld [vmem:[%s2727_s1 + $0x1c8] sm:$0xff]  }
  0x19   : > { %2059 = vmatprep.subr.bf16.mxu0 %v2269_v13  ;;  %v2520_v60 = vld [vmem:[%s2402_s10 + $0x42] sm:$0xff]  ;;  %v2526_v62 = vld [vmem:[%s2402_s10 + $0x50] sm:$0xff]  ;;  %v181_v63 = vpack.c.bf16 %v2508_v56, %v2505_v55 }
  0x1a   : > { %v2523_v61 = vld [vmem:[%s2402_s10 + $0x40] sm:$0xff]  ;;  %v2534_v1 = vld [vmem:[%s2402_s10 + $0x52] sm:$0xff]  ;;  %v915_v2 = vpack.c.bf16 %v2520_v60, %v2514_v58 }
  0x1b   : > { %1964 = vmatpush3.bf16.msra.mxu1 %v2268_v10  ;;  %v2539_v3 = vld [vmem:[%s2402_s10 + $0x62] sm:$0xff]  ;;  %v2546_v5 = vpack.c.bf16 %v2526_v62, %v2523_v61  ;;  %v2294_v7 = vld [vmem:[%s2727_s1 + $0x90] sm:$0xff]  }
  0x1c   : > { %2060 = vmatpush3.bf16.msra.mxu0 %v2269_v13  ;;  %1965 = vmatprep.subr.bf16.mxu1 %v2270_v17  ;;  %v2549_v6 = vld [vmem:[%s2402_s10 + $0x60] sm:$0xff]  ;;  %v916_v8 = vpack.c.bf16 %v2539_v3, %v2534_v1  ;;  %v2557_v9 = vld [vmem:[%s2402_s10 + $0x70] sm:$0xff] }
  0x1d   : > { %2061 = vmatprep.subr.bf16.mxu0 %v2271_v18  ;;  %v2560_v10 = vld [vmem:[%s2402_s10 + $0x72] sm:$0xff]  ;;  %v2563_v11 = vld [vmem:[%s2402_s10 + $0x82] sm:$0xff]  ;;  %v183_v13 = vpack.c.bf16 %v2557_v9, %v2549_v6 }
  0x1e   : > { %v2295_v12 = vld [vmem:[%s2727_s1 + $0x190] sm:$0xff]   ;;  %v455_v14 = vld [vmem:[%s2402_s10 + $0x2] sm:$0xff]  ;;  %v917_v15 = vpack.c.bf16 %v2563_v11, %v2560_v10 }
  0x1f   : > { %1966 = vmatpush3.bf16.msra.mxu1 %v2270_v17  ;;  %v2297_v17 = vld [vmem:[%s2727_s1 + $0x198] sm:$0xff]   ;;  %v2302_v23 = vld [vmem:[%s2727_s1 + $0xb0] sm:$0xff]   ;;  %v2306_v28 = vld [vmem:[%s2727_s1 + $0xc0] sm:$0xff]  }
  0x20   : > { %2062 = vmatpush3.bf16.msra.mxu0 %v2271_v18  ;;  %1967 = vmatprep.subr.bf16.mxu1 %v2272_v19  ;;  %v463_v18 = vpack.c.bf16 %v2465_v41, %v455_v14  ;;  %v2631_v38 = vld [vmem:[%s2402_s10 + $0x80] sm:$0xff]  ;;  %v2311_v41 = vld [vmem:[%s2727_s1 + $0x1d0] sm:$0xff]  }
  0x21   : > { %2063 = vmatprep.subr.bf16.mxu0 %v2273_v20 }
  0x23   : > { %1968 = vmatpush3.bf16.msra.mxu1 %v2272_v19  ;;  %v2298_v19 = vld [vmem:[%s2727_s1 + $0xa0] sm:$0xff]  }
  0x24   : > { %2064 = vmatpush3.bf16.msra.mxu0 %v2273_v20  ;;  %1977 = vmatprep.subr.bf16.mxu1 %v2274_v21  ;;  %v2299_v20 = vld [vmem:[%s2727_s1 + $0x1a0] sm:$0xff]  }
  0x25   : > { %2073 = vmatprep.subr.bf16.mxu0 %v2275_v24 }
  0x26   : > { %1970 = vmatmul.mubr.bf16.vlgmr.msra.gmra.mrb[0].mxu1 %v2433_v25 }
  0x27   : > { %1978 = vmatpush3.bf16.msra.mxu1 %v2274_v21  ;;  %2066 = vmatmul.mubr.bf16.vlgmr.msra.gmra.mrb[0].mxu0 %v765_v27  ;;  %v2300_v21 = vld [vmem:[%s2727_s1 + $0xa8] sm:$0xff]   ;;  %v2305_v27 = vld [vmem:[%s2727_s1 + $0x1b8] sm:$0xff]  }
  0x28   : > { %2074 = vmatpush3.bf16.msra.mxu0 %v2275_v24  ;;  %1979 = vmatprep.subr.bf16.mxu1 %v2276_v29  ;;  %v2303_v24 = vld [vmem:[%s2727_s1 + $0x1b0] sm:$0xff]  }
  0x29   : > { %2075 = vmatprep.subr.bf16.mxu0 %v2277_v30  ;;  %1973 = vmatprep.mubr.bf16.mxu1 %v2443_v31 }
  0x2a   : > { %2069 = vmatprep.mubr.bf16.mxu0 %v766_v32  ;;  %v2308_v32 = vld [vmem:[%s2727_s1 + $0xc8] sm:$0xff]  }
  0x2b   : > { %1980 = vmatpush3.bf16.msra.mxu1 %v2276_v29  ;;  %v2307_v29 = vld [vmem:[%s2727_s1 + $0x1c0] sm:$0xff]  }
  0x2c   : > { %2076 = vmatpush3.bf16.msra.mxu0 %v2277_v30  ;;  %1981 = vmatprep.subr.bf16.mxu1 %v2278_v34  ;;  %v2613_v30 = vpack.c.bf16 %v2514_v58, %v2468_v42  ;;  %v2640_v42 = vpack.c.bf16 %v2560_v10, %v2539_v3  ;;  %v1784_v58 = vld [vmem:[%s2402_s10 + $0x91] sm:$0xff] }
  0x2d   : > { %2077 = vmatprep.subr.bf16.mxu0 %v2279_v36 }
  0x2e   : > { %1974 = vmatmul.mubr.bf16.gmra.mrb[4].mxu1 %v2457_v37 }
  0x2f   : > { %1982 = vmatpush3.bf16.msra.mxu1 %v2278_v34  ;;  %2070 = vmatmul.mubr.bf16.gmra.mrb[4].mxu0 %v767_v40  ;;  %v2623_v34 = vpack.c.bf16 %v2534_v1, %v2520_v60  ;;  %v1752_v40 = vld [vmem:[%s2402_s10 + $0x90] sm:$0xff]  ;;  %v1218_v60 = vpack.c.bf16 %v1784_v58, %v2451_v35  ;;  %v2327_v35 = vld [vmem:[%s2727_s1 + $0x228] sm:$0xff]  }
  0x30   : > { %2078 = vmatpush3.bf16.msra.mxu0 %v2279_v36  ;;  %1983 = vmatprep.subr.bf16.mxu1 %v2280_v43  ;;  %v2310_v36 = vld [vmem:[%s2727_s1 + $0xd0] sm:$0xff]  }
  0x31   : > { %2079 = vmatprep.subr.bf16.mxu0 %v2281_v44  ;;  %1993 = vmatprep.mubr.bf16.mxu1 %v180_v45  ;;  %v2313_v45 = vld [vmem:[%s2727_s1 + $0x1d8] sm:$0xff]  }
  0x32   : > { %2089 = vmatprep.mubr.bf16.mxu0 %v914_v46  ;;  %v614_v46 = vpack.c.bf16 %v2505_v55, %v2461_v39  ;;  %v2316_v39 = vld [vmem:[%s2727_s1 + $0xe8] sm:$0xff]  }
  0x33   : > { %1984 = vmatpush3.bf16.msra.mxu1 %v2280_v43  ;;  %v1068_v43 = vpack.c.bf16 %v1752_v40, %v2631_v38  ;;  %v2323_v55 = vld [vmem:[%s2727_s1 + $0x208] sm:$0xff]  }
  0x34   : > { %2080 = vmatpush3.bf16.msra.mxu0 %v2281_v44  ;;  %1985 = vmatprep.subr.bf16.mxu1 %v2282_v47  ;;  %v2312_v44 = vld [vmem:[%s2727_s1 + $0xd8] sm:$0xff]  }
  0x35   : > { %2081 = vmatprep.subr.bf16.mxu0 %v2283_v48 }
  0x37   : > { %1986 = vmatpush3.bf16.msra.mxu1 %v2282_v47  ;;  %v2314_v47 = vld [vmem:[%s2727_s1 + $0xe0] sm:$0xff]  }
  0x38   : > { %2082 = vmatpush3.bf16.msra.mxu0 %v2283_v48  ;;  %1987 = vmatprep.subr.bf16.mxu1 %v2284_v49  ;;  %v2315_v48 = vld [vmem:[%s2727_s1 + $0x1e0] sm:$0xff]  }
  0x39   : > { %2083 = vmatprep.subr.bf16.mxu0 %v2285_v50 }
  0x3b   : > { %1988 = vmatpush3.bf16.msra.mxu1 %v2284_v49  ;;  %v2317_v49 = vld [vmem:[%s2727_s1 + $0x1e8] sm:$0xff]  }
  0x3c   : > { %2084 = vmatpush3.bf16.msra.mxu0 %v2285_v50  ;;  %1989 = vmatprep.subr.bf16.mxu1 %v2286_v51  ;;  %v2318_v50 = vld [vmem:[%s2727_s1 + $0xf0] sm:$0xff]  }
  0x3d   : > { %2085 = vmatprep.subr.bf16.mxu0 %v2287_v52 }
  0x3f   : > { %1990 = vmatpush3.bf16.msra.mxu1 %v2286_v51  ;;  %v2320_v51 = vld [vmem:[%s2727_s1 + $0xf8] sm:$0xff]  }
  0x40   : > { %2086 = vmatpush3.bf16.msra.mxu0 %v2287_v52  ;;  %1991 = vmatprep.subr.bf16.mxu1 %v2288_v53  ;;  %v2321_v52 = vld [vmem:[%s2727_s1 + $0x1f8] sm:$0xff]  }
  0x41   : > { %2087 = vmatprep.subr.bf16.mxu0 %v2289_v54 }
  0x43   : > { %1992 = vmatpush3.bf16.msra.mxu1 %v2288_v53  ;;  %v2322_v53 = vld [vmem:[%s2727_s1 + $0x200] sm:$0xff]  }
  0x44   : > { %2088 = vmatpush3.bf16.msra.mxu0 %v2289_v54  ;;  %2001 = vmatprep.subr.bf16.mxu1 %v2290_v57  ;;  %v615_v54 = vpack.c.bf16 %v2523_v61, %v2508_v56  ;;  %v2324_v56 = vld [vmem:[%s2727_s1 + $0x210] sm:$0xff]  }
  0x45   : > { %2097 = vmatprep.subr.bf16.mxu0 %v2291_v59  ;;  %v2328_v61 = vld [vmem:[%s2727_s1 + $0x230] sm:$0xff]  }
  0x46   : > { %1994 = vmatmul.mubr.bf16.vlgmr.msra.gmra.mrb[0].mxu1 %v181_v63 }
  0x47   : > { %2002 = vmatpush3.bf16.msra.mxu1 %v2290_v57  ;;  %2090 = vmatmul.mubr.bf16.vlgmr.msra.gmra.mrb[0].mxu0 %v915_v2  ;;  %v616_v57 = vpack.c.bf16 %v2549_v6, %v2526_v62  ;;  %v2329_v62 = vld [vmem:[%s2727_s1 + $0x238] sm:$0xff]  }
  0x48   : > { %2098 = vmatpush3.bf16.msra.mxu0 %v2291_v59  ;;  %2003 = vmatprep.subr.bf16.mxu1 %v2292_v0  ;;  %v617_v59 = vpack.c.bf16 %v2631_v38, %v2557_v9 }
  0x49   : > { %2099 = vmatprep.subr.bf16.mxu0 %v2293_v4  ;;  %1997 = vmatprep.mubr.bf16.mxu1 %v2546_v5 }
  0x4a   : > { %2093 = vmatprep.mubr.bf16.mxu0 %v916_v8 }
  0x4b   : > { %2004 = vmatpush3.bf16.msra.mxu1 %v2292_v0 }
  0x4c   : > { %2100 = vmatpush3.bf16.msra.mxu0 %v2293_v4  ;;  %2005 = vmatprep.subr.bf16.mxu1 %v2294_v7 }
  0x4d   : > { %2101 = vmatprep.subr.bf16.mxu0 %v2295_v12 }
  0x4e   : > { %1998 = vmatmul.mubr.bf16.gmra.mrb[4].mxu1 %v183_v13 }
  0x4f   : > { %2006 = vmatpush3.bf16.msra.mxu1 %v2294_v7  ;;  %2094 = vmatmul.mubr.bf16.gmra.mrb[4].mxu0 %v917_v15 }
  0x50   : > { %2102 = vmatpush3.bf16.msra.mxu0 %v2295_v12  ;;  %2007 = vmatprep.subr.bf16.mxu1 %v2296_v16 }
  0x51   : > { %2103 = vmatprep.subr.bf16.mxu0 %v2297_v17  ;;  %2017 = vmatprep.mubr.bf16.mxu1 %v463_v18 }
  0x52   : > { %2113 = vmatprep.mubr.bf16.mxu0 %v181_v63  ;;  %v1816_v63 = vld [vmem:[%s2402_s10 + $0x92] sm:$0xff]  ;;  %s1844_s10 = sshll.u32 %s2731_s13, 6 }
  0x53   : > { %2008 = vmatpush3.bf16.msra.mxu1 %v2296_v16  ;;  %v1368_v0 = vpack.c.bf16 %v1816_v63, %v2563_v11  ;;  %s170_s21 = scalar_lea.vmem %s2729_s3, %s1844_s10 }
  0x54   : > { %2104 = vmatpush3.bf16.msra.mxu0 %v2297_v17  ;;  %2009 = vmatprep.subr.bf16.mxu1 %v2298_v19  ;;  %v1841_v17 = vld [vmem:[%s2728_s2] ss:$0 sm:$0xff] }
  0x55   : > { %2105 = vmatprep.subr.bf16.mxu0 %v2299_v20 }
  0x57   : > { %2010 = vmatpush3.bf16.msra.mxu1 %v2298_v19 }
  0x58   : > { %2106 = vmatpush3.bf16.msra.mxu0 %v2299_v20  ;;  %2011 = vmatprep.subr.bf16.mxu1 %v2300_v21 }
  0x59   : > { %2107 = vmatprep.subr.bf16.mxu0 %v2301_v22 }
  0x5b   : > { %2012 = vmatpush3.bf16.msra.mxu1 %v2300_v21 }
  0x5c   : > { %2108 = vmatpush3.bf16.msra.mxu0 %v2301_v22  ;;  %2013 = vmatprep.subr.bf16.mxu1 %v2302_v23 }
  0x5d   : > { %2109 = vmatprep.subr.bf16.mxu0 %v2303_v24 }
  0x5f   : > { %2014 = vmatpush3.bf16.msra.mxu1 %v2302_v23 }
  0x60   : > { %2110 = vmatpush3.bf16.msra.mxu0 %v2303_v24  ;;  %2015 = vmatprep.subr.bf16.mxu1 %v2304_v26 }
  0x61   : > { %2111 = vmatprep.subr.bf16.mxu0 %v2305_v27 }
  0x63   : > { %2016 = vmatpush3.bf16.msra.mxu1 %v2304_v26 }
  0x64   : > { %2112 = vmatpush3.bf16.msra.mxu0 %v2305_v27  ;;  %2025 = vmatprep.subr.bf16.mxu1 %v2306_v28 }
  0x65   : > { %2121 = vmatprep.subr.bf16.mxu0 %v2307_v29 }
  0x66   : > { %2018 = vmatmul.mubr.bf16.vlgmr.msra.gmra.mrb[0].mxu1 %v2613_v30 }
  0x67   : > { %2026 = vmatpush3.bf16.msra.mxu1 %v2306_v28  ;;  %2114 = vmatmul.mubr.bf16.vlgmr.msra.gmra.mrb[0].mxu0 %v2546_v5 }
  0x68   : > { %2122 = vmatpush3.bf16.msra.mxu0 %v2307_v29  ;;  %2027 = vmatprep.subr.bf16.mxu1 %v2308_v32 }
  0x69   : > { %2123 = vmatprep.subr.bf16.mxu0 %v2309_v33  ;;  %2021 = vmatprep.mubr.bf16.mxu1 %v2623_v34 }
  0x6a   : > { %2117 = vmatprep.mubr.bf16.mxu0 %v183_v13 }
  0x6b   : > { %2028 = vmatpush3.bf16.msra.mxu1 %v2308_v32 }
  0x6c   : > { %2124 = vmatpush3.bf16.msra.mxu0 %v2309_v33  ;;  %2029 = vmatprep.subr.bf16.mxu1 %v2310_v36 }
  0x6d   : > { %2125 = vmatprep.subr.bf16.mxu0 %v2311_v41 }
  0x6e   : > { %2022 = vmatmul.mubr.bf16.gmra.mrb[4].mxu1 %v2640_v42 }
  0x6f   : > { %2030 = vmatpush3.bf16.msra.mxu1 %v2310_v36  ;;  %2118 = vmatmul.mubr.bf16.gmra.mrb[4].mxu0 %v1068_v43 }
  0x70   : > { %2126 = vmatpush3.bf16.msra.mxu0 %v2311_v41  ;;  %2031 = vmatprep.subr.bf16.mxu1 %v2312_v44 }
  0x71   : > { %2127 = vmatprep.subr.bf16.mxu0 %v2313_v45  ;;  %2041 = vmatprep.mubr.bf16.mxu1 %v614_v46 }
  0x72   : > { %2137 = vmatprep.mubr.bf16.mxu0 %v2433_v25  ;;  %v2319_v25 = vld [vmem:[%s2727_s1 + $0x1f0] sm:$0xff]  }
  0x73   : > { %2032 = vmatpush3.bf16.msra.mxu1 %v2312_v44 }
  0x74   : > { %2128 = vmatpush3.bf16.msra.mxu0 %v2313_v45  ;;  %2033 = vmatprep.subr.bf16.mxu1 %v2314_v47 }
  0x75   : > { %2129 = vmatprep.subr.bf16.mxu0 %v2315_v48 }
  0x77   : > { %2034 = vmatpush3.bf16.msra.mxu1 %v2314_v47 }
  0x78   : > { %2130 = vmatpush3.bf16.msra.mxu0 %v2315_v48  ;;  %2035 = vmatprep.subr.bf16.mxu1 %v2316_v39 }
  0x79   : > { %2131 = vmatprep.subr.bf16.mxu0 %v2317_v49 }
  0x7b   : > { %2036 = vmatpush3.bf16.msra.mxu1 %v2316_v39 }
  0x7c   : > { %2132 = vmatpush3.bf16.msra.mxu0 %v2317_v49  ;;  %2037 = vmatprep.subr.bf16.mxu1 %v2318_v50 }
  0x7d   : > { %2133 = vmatprep.subr.bf16.mxu0 %v2319_v25 }
  0x7f   : > { %2038 = vmatpush3.bf16.msra.mxu1 %v2318_v50 }
  0x80   : > { %2134 = vmatpush3.bf16.msra.mxu0 %v2319_v25  ;;  %2039 = vmatprep.subr.bf16.mxu1 %v2320_v51 }
  0x81   : > { %2135 = vmatprep.subr.bf16.mxu0 %v2321_v52 }
  0x83   : > { %2040 = vmatpush3.bf16.msra.mxu1 %v2320_v51 }
  0x84   : > { %2136 = vmatpush3.bf16.msra.mxu0 %v2321_v52  ;;  %2169 = vmatprep.subr.bf16.mxu1 %v2322_v53 }
  0x85   : > { %2145 = vmatprep.subr.bf16.mxu0 %v2322_v53 }
  0x86   : > { %2042 = vmatmul.mubr.bf16.vlgmr.msra.gmra.mrb[0].mxu1 %v615_v54 }
  0x87   : > { %2138 = vmatmul.mubr.bf16.vlgmr.msra.gmra.mrb[0].mxu0 %v2443_v31  ;;  %2177 = vmatpush3.bf16.msra.mxu1 %v2322_v53  ;;  %v2325_v31 = vld [vmem:[%s2727_s1 + $0x218] sm:$0xff]  }
  0x88   : > { %2146 = vmatpush3.bf16.msra.mxu0 %v2322_v53  ;;  %2170 = vmatprep.subr.bf16.mxu1 %v2323_v55 }
  0x89   : > { %2147 = vmatprep.subr.bf16.mxu0 %v2323_v55  ;;  %2045 = vmatprep.mubr.bf16.mxu1 %v616_v57 }
  0x8a   : > { %2141 = vmatprep.mubr.bf16.mxu0 %v2457_v37  ;;  %v2326_v37 = vld [vmem:[%s2727_s1 + $0x220] sm:$0xff]  }
  0x8b   : > { %2178 = vmatpush3.bf16.msra.mxu1 %v2323_v55 }
  0x8c   : > { %2148 = vmatpush3.bf16.msra.mxu0 %v2323_v55  ;;  %2171 = vmatprep.subr.bf16.mxu1 %v2324_v56 }
  0x8d   : > { %2149 = vmatprep.subr.bf16.mxu0 %v2324_v56 }
  0x8e   : > { %2046 = vmatmul.mubr.bf16.gmra.mrb[4].mxu1 %v617_v59 }
  0x8f   : > { %2142 = vmatmul.mubr.bf16.gmra.mrb[4].mxu0 %v1218_v60  ;;  %2179 = vmatpush3.bf16.msra.mxu1 %v2324_v56 }
  0x90   : > { %2150 = vmatpush3.bf16.msra.mxu0 %v2324_v56  ;;  %2172 = vmatprep.subr.bf16.mxu1 %v2325_v31 }
  0x91   : > { %2151 = vmatprep.subr.bf16.mxu0 %v2325_v31  ;;  %2161 = vmatprep.mubr.bf16.mxu0 %v2613_v30 }
  0x92   : > { %2165 = vmatprep.mubr.bf16.mxu1 %v2640_v42 }
  0x93   : > { %2180 = vmatpush3.bf16.msra.mxu1 %v2325_v31 }
  0x94   : > { %2152 = vmatpush3.bf16.msra.mxu0 %v2325_v31  ;;  %2173 = vmatprep.subr.bf16.mxu1 %v2326_v37 }
  0x95   : > { %2153 = vmatprep.subr.bf16.mxu0 %v2326_v37 }
  0x97   : > { %2181 = vmatpush3.bf16.msra.mxu1 %v2326_v37 }
  0x98   : > { %2154 = vmatpush3.bf16.msra.mxu0 %v2326_v37  ;;  %2174 = vmatprep.subr.bf16.mxu1 %v2327_v35 }
  0x99   : > { %2155 = vmatprep.subr.bf16.mxu0 %v2327_v35 }
  0x9b   : > { %2182 = vmatpush3.bf16.msra.mxu1 %v2327_v35 }
  0x9c   : > { %2156 = vmatpush3.bf16.msra.mxu0 %v2327_v35  ;;  %2175 = vmatprep.subr.bf16.mxu1 %v2328_v61 }
  0x9d   : > { %2157 = vmatprep.subr.bf16.mxu0 %v2328_v61 }
  0x9f   : > { %2183 = vmatpush3.bf16.msra.mxu1 %v2328_v61 }
  0xa0   : > { %2158 = vmatpush3.bf16.msra.mxu0 %v2328_v61  ;;  %2176 = vmatprep.subr.bf16.mxu1 %v2329_v62 }
  0xa1   : > { %2159 = vmatprep.subr.bf16.mxu0 %v2329_v62 }
  0xa3   : > { %2184 = vmatpush3.bf16.msra.mxu1 %v2329_v62 }
  0xa4   : > { %2160 = vmatpush3.bf16.msra.mxu0 %v2329_v62 }
  0xa6   : > { %2166 = vmatmul.mubr.bf16.vlgmr.msra.gmra.mrb[8].mxu1 %v1368_v0 }
  0xa7   : > { %2162 = vmatmul.mubr.bf16.vlgmr.msra.gmra.mrb[0].mxu0 %v2623_v34 }
 0x159   : > { %v2043_v1 = vpop.f32.mrb[0].mxu1 }
 0x15a   : > { %v717_v2 = vpop.f32.mrb[1].mxu1 }
 0x15b   : > { %v2044_v3 = vpop.f32.mrb[2].mxu1 }
 0x15c   : > { %v720_v4 = vpop.f32.mrb[3].mxu1 }
 0x161   : > { %v2047_v5 = vpop.f32.mrb[4].mxu1 }
 0x162   : > { %v2143_v6 = vpop.f32.mrb[4].mxu0  ;;  %v733_v7 = vpop.f32.mrb[5].mxu1 }
 0x163   : > { %v2189_v8 = vadd.f32 %v2143_v6, %v2047_v5  ;;  %v1334_v9 = vpop.f32.mrb[5].mxu0  ;;  %v2048_v10 = vpop.f32.mrb[6].mxu1 }
 0x164   : > { %v2191_v12 = vadd.f32 %v1334_v9, %v733_v7  ;;  %v2144_v13 = vpop.f32.mrb[6].mxu0  ;;  %v736_v14 = vpop.f32.mrb[7].mxu1 }
 0x165   : > { %v2193_v11 = vadd.f32 %v2144_v13, %v2048_v10  ;;  %v1337_v15 = vpop.f32.mrb[7].mxu0 }
 0x166   : > { %v2195_v16 = vadd.f32 %v1337_v15, %v736_v14 }
 0x179   : > { %v2167_v18 = vpop.f32.mrb[8].mxu1 }
 0x17a   : > { %v2163_v19 = vpop.f32.mrb[0].mxu0  ;;  %v2190_v20 = vadd.f32 %v2189_v8, %v2167_v18  ;;  %v1484_v21 = vpop.f32.mrb[9].mxu1 }
 0x17b   : > { %v2185_v22 = vadd.f32 %v2163_v19, %v2043_v1  ;;  %v1468_v23 = vpop.f32.mrb[1].mxu0  ;;  %v2192_v24 = vadd.f32 %v2191_v12, %v1484_v21  ;;  %v2168_v26 = vpop.f32.mrb[10].mxu1 }
 0x17c   : > { %v1520_v27 = vadd.f32 %v2190_v20, %v1841_v17  ;;  %v2186_v28 = vadd.f32 %v1468_v23, %v717_v2  ;;  %v2164_v29 = vpop.f32.mrb[2].mxu0  ;;  %v2194_v30 = vadd.f32 %v2193_v11, %v2168_v26  ;;  %v1487_v32 = vpop.f32.mrb[11].mxu1 }
 0x17d   : > { %v1516_v33 = vadd.f32 %v2185_v22, %v1841_v17  ;;  %v1518_v34 = vadd.f32 %v2192_v24, %v1841_v17  ;;  %v2187_v36 = vadd.f32 %v2164_v29, %v2044_v3  ;;  %v1471_v38 = vpop.f32.mrb[3].mxu0  ;;  %v2196_v40 = vadd.f32 %v2195_v16, %v1487_v32 }
 0x17e   : > { %1528 = vst [vmem:[%s170_s21 + $0x30] sm:$0xff] %v1520_v27  ;;  %v1514_v41 = vadd.f32 %v2186_v28, %v1841_v17  ;;  %v1521_v42 = vadd.f32 %v2194_v30, %v1841_v17  ;;  %v2188_v43 = vadd.f32 %v1471_v38, %v720_v4 }
 0x17f   : > { %1524 = vst [vmem:[%s170_s21 + $0x10] sm:$0xff] %v1516_v33  ;;  %1526 = vst [vmem:[%s170_s21 + $0x20] sm:$0xff] %v1518_v34  ;;  %v1517_v44 = vadd.f32 %v2187_v36, %v1841_v17  ;;  %v1519_v45 = vadd.f32 %v2196_v40, %v1841_v17 }
 0x180   : > { %1522 = vst [vmem:[%s170_s21] sm:$0xff] %v1514_v41  ;;  %1529 = vst [vmem:[%s170_s21 + $0x38] sm:$0xff] %v1521_v42  ;;  %v1515_v46 = vadd.f32 %v2188_v43, %v1841_v17 }
 0x181   : > { %1525 = vst [vmem:[%s170_s21 + $0x18] sm:$0xff] %v1517_v44  ;;  %1527 = vst [vmem:[%s170_s21 + $0x28] sm:$0xff] %v1519_v45 }
 0x182   : > { %1523 = vst [vmem:[%s170_s21 + $0x8] sm:$0xff] %v1515_v46 }
 0x183 PF: > { %s13_s12 = sadd.s32 1, %s2336_s12  }
 0x184   : > { %p10_p4 = scmp.ge.s32.totalorder %s13_s12, 4  }
 0x186   :  { %12 = sbr.rel (!%p10_p4) target bundleno = 1 (0x1), region = 72 }

</bundles_post_ra>
